<compile_context>
chip_gen: v7x
topology: tpu7x:2x2x1
jax: 0.10.0
libtpu: 0.0.40
codegen_flags: <defaults>
</compile_context>

<pallas_src>
import functools

import numpy as np
import jax
import jax.numpy as jnp
from jax import lax
from jax.experimental import pallas as pl
from jax.experimental.pallas import tpu as pltpu


def _rel_pos_emb_kernel(q_ref, rel_ref, exp_ref, o_ref, *, height, width):
    """One grid step = T heads.

    q_ref:   (T, H*W, d)                 query block
    rel_ref: ((2W-1)+(2H-1), d)          concat([rel_width, rel_height], axis=0)
    exp_ref: (W+H, H*W)                  constant 0/1 expansion matrix
    o_ref:   (T, H*W, H*W)               output logits block
    """
    H, W = height, width
    HW = H * W
    T = q_ref.shape[0]
    d = q_ref.shape[2]
    ncat = rel_ref.shape[0]              # (2W-1) + (2H-1)

    # --- One MXU matmul against the concatenated relative tables -------------
    # (Contract on d directly; M = T*HW keeps the systolic array busy.)
    # TODO(synk): on v6e/v7x, casting q/rel to bf16 (keeping f32 accumulation)
    # would double MXU throughput; kept f32 here to match the f32 reference.
    q = q_ref[...].reshape(T * HW, d)
    lwh = lax.dot_general(
        q, rel_ref[...],
        dimension_numbers=(((1,), (1,)), ((), ())),
        preferred_element_type=jnp.float32)          # [T*HW, ncat] (f32)
    lwh4 = lwh.reshape(T, H, W, ncat)                # rows = (t, x, y)

    # --- rel -> abs via small static slices (no one-hot, no 3D temporaries) --
    # Width: ow[t, x, y, j] = lw[t, x, y, j - y + (W-1)],  j in [0, W)
    w_parts = [
        lax.slice(lwh4, (0, 0, y, W - 1 - y), (T, H, y + 1, 2 * W - 1 - y))
        for y in range(W)
    ]                                                 # each [T, H, 1, W]
    ow = jnp.concatenate(w_parts, axis=2)             # [T, H, W, W]

    # Height: oh[t, x, y, i] = lh[t, x, y, i - x + (H-1)],  i in [0, H)
    off = 2 * W - 1                                   # lh starts after the width lanes
    h_parts = [
        lax.slice(lwh4, (0, x, 0, off + H - 1 - x),
                  (T, x + 1, W, off + 2 * H - 1 - x))
        for x in range(H)
    ]                                                 # each [T, 1, W, H]
    oh = jnp.concatenate(h_parts, axis=1)             # [T, H, W, H]

    # --- Expand to the full logits with one small matmul ---------------------
    # out[r, i*W + j] = ow[r, j] + oh[r, i]  via a constant 0/1 matrix:
    # lane-dense output, no per-element broadcast work on the VPU.
    g = jnp.concatenate(
        [ow.reshape(T * HW, W), oh.reshape(T * HW, H)], axis=-1)   # [T*HW, W+H]
    out = jnp.dot(g, exp_ref[...], preferred_element_type=jnp.float32)  # [T*HW, HW]

    # HW=64 < 128 lanes -> masked stores; accepted for 8x8 (clean at HW>=128).
    o_ref[...] = out.reshape(T, HW, HW).astype(o_ref.dtype)


def _pick_head_tile(G, HW, d, itemsize):
    """Largest divisor of G whose per-step block (in + out) stays small, preferring
    >= 2 grid steps so both v7x TensorCores get work."""
    budget = 2 * 1024 * 1024
    divisors = [t for t in range(1, G + 1) if G % t == 0]
    cand = [t for t in divisors if t * HW * (d + HW) * itemsize <= budget] or [1]
    t = max(cand)
    if t == G and G > 1:
        smaller = [x for x in cand if x < G]
        if smaller:
            t = max(smaller)
    return t


def rel_pos_emb(q, rel_height, rel_width, *, height, width, head_tile=None):
    """q: [B, Nh, H*W, d]; rel_height: [2H-1, d]; rel_width: [2W-1, d]."""
    B, Nh, L, d = q.shape
    H, W = height, width
    HW = H * W
    assert L == HW
    G = B * Nh
    T = head_tile if head_tile is not None else _pick_head_tile(
        G, HW, d, np.dtype(q.dtype).itemsize)
    assert G % T == 0

    q_flat = q.reshape(G, HW, d)                                  # trivial merge
    rel_cat = jnp.concatenate([rel_width, rel_height], axis=0)    # [(2W-1)+(2H-1), d]
    ncat = (2 * W - 1) + (2 * H - 1)

    # Constant expansion matrix: row j (< W) tiles the width term across key-rows,
    # row W+i repeats the height term across key-columns.
    e = np.zeros((W + H, HW), dtype=np.float32)
    for i in range(H):
        e[np.arange(W), i * W + np.arange(W)] = 1.0
        e[W + i, i * W:(i + 1) * W] = 1.0
    e = jnp.asarray(e)

    kernel = functools.partial(_rel_pos_emb_kernel, height=H, width=W)
    out = pl.pallas_call(
        kernel,
        out_shape=jax.ShapeDtypeStruct((G, HW, HW), q.dtype),
        grid_spec=pltpu.PrefetchScalarGridSpec(
            num_scalar_prefetch=0,
            grid=(G // T,),
            in_specs=[
                pl.BlockSpec((T, HW, d), lambda g: (g, 0, 0)),
                pl.BlockSpec((ncat, d), lambda g: (0, 0)),
                pl.BlockSpec((W + H, HW), lambda g: (0, 0)),
            ],
            out_specs=pl.BlockSpec((T, HW, HW), lambda g: (g, 0, 0)),
        ),
        compiler_params=pltpu.CompilerParams(
            dimension_semantics=("parallel",)),
    )(q_flat, rel_cat, e)
    return out.reshape(B, Nh, HW, HW)


# ----------------------------------------------------------------------------
# Pure-JAX reference that mirrors the PyTorch code path (for verification).
# ----------------------------------------------------------------------------
def _rel_to_abs_ref(x):
    B, Nh, L, _ = x.shape
    x = jnp.concatenate([x, jnp.zeros((B, Nh, L, 1), x.dtype)], axis=3)
    flat = x.reshape(B, Nh, L * 2 * L)
    flat = jnp.concatenate([flat, jnp.zeros((B, Nh, L - 1), x.dtype)], axis=2)
    final = flat.reshape(B, Nh, L + 1, 2 * L - 1)
    return final[:, :, :L, L - 1:]


def _relative_logits_1d_ref(q, rel_k):
    B, Nh, H, W, _ = q.shape
    rl = jnp.einsum('bnhwd,md->bnhwm', q, rel_k)
    rl = rl.reshape(B, Nh * H, W, 2 * W - 1)
    rl = _rel_to_abs_ref(rl)
    rl = rl.reshape(B, Nh, H, W, W)
    rl = jnp.broadcast_to(rl[:, :, :, None, :, :], (B, Nh, H, H, W, W))
    return rl


def rel_pos_emb_ref(q, rel_height, rel_width, *, height, width):
    B, Nh, L, d = q.shape
    q5 = q.reshape(B, Nh, height, width, d)
    lw = _relative_logits_1d_ref(q5, rel_width)                 # b n x i y j
    lw = lw.transpose(0, 1, 2, 4, 3, 5).reshape(B, Nh, L, L)    # 'b h x i y j -> b h (x y)(i j)'
    qt = q5.transpose(0, 1, 3, 2, 4)                            # b n y x d
    lh = _relative_logits_1d_ref(qt, rel_height)                # b n x i y j  (x,i in W; y,j in H)
    lh = lh.transpose(0, 1, 4, 2, 5, 3).reshape(B, Nh, L, L)    # 'b h x i y j -> b h (y x)(j i)'
    return lw + lh


if __name__ == "__main__":
    B, Nh, H, W, d = 2, 4, 8, 8, 32
    key = jax.random.PRNGKey(0)
    kq, kh, kw = jax.random.split(key, 3)

    # Deterministic parameter init, matching nn.Parameter(torch.randn(...) * dim_head**-0.5)
    scale = d ** (-0.5)
    rel_height = jax.random.normal(kh, (2 * H - 1, d), dtype=jnp.float32) * scale
    rel_width = jax.random.normal(kw, (2 * W - 1, d), dtype=jnp.float32) * scale
    q = jax.random.normal(kq, (B, Nh, H * W, d), dtype=jnp.float32)

    out = rel_pos_emb(q, rel_height, rel_width, height=H, width=W)
    out = jax.block_until_ready(out)

    ref = rel_pos_emb_ref(q, rel_height, rel_width, height=H, width=W)
    np.testing.assert_allclose(np.asarray(out), np.asarray(ref), rtol=1e-4, atol=1e-4)

    print("KERNEL_OK")
</pallas_src>

<mosaic_0001>
module attributes {stable_mosaic.version = 11 : i64} {
  func.func @_rel_pos_emb_kernel(%arg0: i32, %arg1: memref<4x64x32xf32, #tpu.memory_space<vmem>>, %arg2: memref<30x32xf32, #tpu.memory_space<vmem>>, %arg3: memref<16x64xf32, #tpu.memory_space<vmem>>, %arg4: memref<4x64x64xf32, #tpu.memory_space<vmem>>) attributes {dimension_semantics = [#tpu.dimension_semantics<parallel>], iteration_bounds = array<i64: 2>, scalar_prefetch = 0 : i64, scratch_operands = 0 : i64, tpu.core_type = #tpu.core_type<tc>, window_params = [{transform_indices = @transform_0, window_bounds = array<i64: 4, 64, 32>}, {pipeline_mode = #tpu.pipeline_mode<synchronous>, transform_indices = @transform_1, window_bounds = array<i64: 30, 32>}, {pipeline_mode = #tpu.pipeline_mode<synchronous>, transform_indices = @transform_2, window_bounds = array<i64: 16, 64>}, {transform_indices = @transform_3, window_bounds = array<i64: 4, 64, 64>}]} {
    %c0 = arith.constant 0 : index
    %c0_0 = arith.constant 0 : index
    %c0_1 = arith.constant 0 : index
    %0 = vector.load %arg1[%c0, %c0_0, %c0_1] : memref<4x64x32xf32, #tpu.memory_space<vmem>>, vector<4x64x32xf32>
    %1 = vector.shape_cast %0 : vector<4x64x32xf32> to vector<256x32xf32>
    %c0_2 = arith.constant 0 : index
    %c0_3 = arith.constant 0 : index
    %2 = vector.load %arg2[%c0_2, %c0_3] : memref<30x32xf32, #tpu.memory_space<vmem>>, vector<30x32xf32>
    %cst = arith.constant dense<0.000000e+00> : vector<256x30xf32>
    %3 = tpu.matmul %1, %2, %cst {dimension_numbers = #tpu.dot_dimension_numbers<[1], [1], [0], [0], [0, 0, 1, 0], [], []>} : vector<256x32xf32>, vector<30x32xf32>, vector<256x30xf32> -> vector<256x30xf32>
    %4 = vector.shape_cast %3 : vector<256x30xf32> to vector<4x8x8x30xf32>
    %5 = vector.extract_strided_slice %4 {offsets = [0, 0, 0, 7], sizes = [4, 8, 1, 8], strides = [1, 1, 1, 1]} : vector<4x8x8x30xf32> to vector<4x8x1x8xf32>
    %6 = vector.extract_strided_slice %4 {offsets = [0, 0, 1, 6], sizes = [4, 8, 1, 8], strides = [1, 1, 1, 1]} : vector<4x8x8x30xf32> to vector<4x8x1x8xf32>
    %7 = vector.extract_strided_slice %4 {offsets = [0, 0, 2, 5], sizes = [4, 8, 1, 8], strides = [1, 1, 1, 1]} : vector<4x8x8x30xf32> to vector<4x8x1x8xf32>
    %8 = vector.extract_strided_slice %4 {offsets = [0, 0, 3, 4], sizes = [4, 8, 1, 8], strides = [1, 1, 1, 1]} : vector<4x8x8x30xf32> to vector<4x8x1x8xf32>
    %9 = vector.extract_strided_slice %4 {offsets = [0, 0, 4, 3], sizes = [4, 8, 1, 8], strides = [1, 1, 1, 1]} : vector<4x8x8x30xf32> to vector<4x8x1x8xf32>
    %10 = vector.extract_strided_slice %4 {offsets = [0, 0, 5, 2], sizes = [4, 8, 1, 8], strides = [1, 1, 1, 1]} : vector<4x8x8x30xf32> to vector<4x8x1x8xf32>
    %11 = vector.extract_strided_slice %4 {offsets = [0, 0, 6, 1], sizes = [4, 8, 1, 8], strides = [1, 1, 1, 1]} : vector<4x8x8x30xf32> to vector<4x8x1x8xf32>
    %12 = vector.extract_strided_slice %4 {offsets = [0, 0, 7, 0], sizes = [4, 8, 1, 8], strides = [1, 1, 1, 1]} : vector<4x8x8x30xf32> to vector<4x8x1x8xf32>
    %13 = tpu.concatenate %5, %6, %7, %8, %9, %10, %11, %12 in 2 : vector<4x8x1x8xf32>, vector<4x8x1x8xf32>, vector<4x8x1x8xf32>, vector<4x8x1x8xf32>, vector<4x8x1x8xf32>, vector<4x8x1x8xf32>, vector<4x8x1x8xf32>, vector<4x8x1x8xf32> -> vector<4x8x8x8xf32>
    %14 = vector.extract_strided_slice %4 {offsets = [0, 0, 0, 22], sizes = [4, 1, 8, 8], strides = [1, 1, 1, 1]} : vector<4x8x8x30xf32> to vector<4x1x8x8xf32>
    %15 = vector.extract_strided_slice %4 {offsets = [0, 1, 0, 21], sizes = [4, 1, 8, 8], strides = [1, 1, 1, 1]} : vector<4x8x8x30xf32> to vector<4x1x8x8xf32>
    %16 = vector.extract_strided_slice %4 {offsets = [0, 2, 0, 20], sizes = [4, 1, 8, 8], strides = [1, 1, 1, 1]} : vector<4x8x8x30xf32> to vector<4x1x8x8xf32>
    %17 = vector.extract_strided_slice %4 {offsets = [0, 3, 0, 19], sizes = [4, 1, 8, 8], strides = [1, 1, 1, 1]} : vector<4x8x8x30xf32> to vector<4x1x8x8xf32>
    %18 = vector.extract_strided_slice %4 {offsets = [0, 4, 0, 18], sizes = [4, 1, 8, 8], strides = [1, 1, 1, 1]} : vector<4x8x8x30xf32> to vector<4x1x8x8xf32>
    %19 = vector.extract_strided_slice %4 {offsets = [0, 5, 0, 17], sizes = [4, 1, 8, 8], strides = [1, 1, 1, 1]} : vector<4x8x8x30xf32> to vector<4x1x8x8xf32>
    %20 = vector.extract_strided_slice %4 {offsets = [0, 6, 0, 16], sizes = [4, 1, 8, 8], strides = [1, 1, 1, 1]} : vector<4x8x8x30xf32> to vector<4x1x8x8xf32>
    %21 = vector.extract_strided_slice %4 {offsets = [0, 7, 0, 15], sizes = [4, 1, 8, 8], strides = [1, 1, 1, 1]} : vector<4x8x8x30xf32> to vector<4x1x8x8xf32>
    %22 = tpu.concatenate %14, %15, %16, %17, %18, %19, %20, %21 in 1 : vector<4x1x8x8xf32>, vector<4x1x8x8xf32>, vector<4x1x8x8xf32>, vector<4x1x8x8xf32>, vector<4x1x8x8xf32>, vector<4x1x8x8xf32>, vector<4x1x8x8xf32>, vector<4x1x8x8xf32> -> vector<4x8x8x8xf32>
    %23 = vector.shape_cast %13 : vector<4x8x8x8xf32> to vector<256x8xf32>
    %24 = vector.shape_cast %22 : vector<4x8x8x8xf32> to vector<256x8xf32>
    %25 = tpu.concatenate %23, %24 in 1 : vector<256x8xf32>, vector<256x8xf32> -> vector<256x16xf32>
    %c0_4 = arith.constant 0 : index
    %c0_5 = arith.constant 0 : index
    %26 = vector.load %arg3[%c0_4, %c0_5] : memref<16x64xf32, #tpu.memory_space<vmem>>, vector<16x64xf32>
    %cst_6 = arith.constant dense<0.000000e+00> : vector<256x64xf32>
    %27 = tpu.matmul %25, %26, %cst_6 {dimension_numbers = #tpu.dot_dimension_numbers<[1], [0], [0], [1], [0, 0, 1, 1], [], []>} : vector<256x16xf32>, vector<16x64xf32>, vector<256x64xf32> -> vector<256x64xf32>
    %28 = vector.shape_cast %27 : vector<256x64xf32> to vector<4x64x64xf32>
    %c0_7 = arith.constant 0 : index
    %c0_8 = arith.constant 0 : index
    %c0_9 = arith.constant 0 : index
    %29 = vector.load %arg4[%c0_7, %c0_8, %c0_9] : memref<4x64x64xf32, #tpu.memory_space<vmem>>, vector<4x64x64xf32>
    tpu.vector_store %arg4[%c0_7, %c0_8, %c0_9], %28 {strides = array<i32>} : memref<4x64x64xf32, #tpu.memory_space<vmem>>, vector<4x64x64xf32>,
    return
  }
  func.func @transform_0(%arg0: i32) -> (i32, i32, i32) {
    %c0_i32 = arith.constant 0 : i32
    %c0_i32_0 = arith.constant 0 : i32
    %c0_i32_1 = arith.constant 0 : i32
    return %arg0, %c0_i32, %c0_i32_0 : i32, i32, i32
  }
  func.func @transform_1(%arg0: i32) -> (i32, i32) {
    %c0_i32 = arith.constant 0 : i32
    %c0_i32_0 = arith.constant 0 : i32
    %c0_i32_1 = arith.constant 0 : i32
    return %c0_i32, %c0_i32_0 : i32, i32
  }
  func.func @transform_2(%arg0: i32) -> (i32, i32) {
    %c0_i32 = arith.constant 0 : i32
    %c0_i32_0 = arith.constant 0 : i32
    %c0_i32_1 = arith.constant 0 : i32
    return %c0_i32, %c0_i32_0 : i32, i32
  }
  func.func @transform_3(%arg0: i32) -> (i32, i32, i32) {
    %c0_i32 = arith.constant 0 : i32
    %c0_i32_0 = arith.constant 0 : i32
    %c0_i32_1 = arith.constant 0 : i32
    return %arg0, %c0_i32, %c0_i32_0 : i32, i32, i32
  }
}

</mosaic_0001>

<bundles_post_ra>
// kernel: tpu_custom_call.1
= control target key start
LH: loop header
LB: loop body
LE: loop exit
PB: predicated region body
PF: predicated region fallthrough
CT: control target
= control target key end

     0   :  { %8 = vsyncpa [#allocation3], 0  ;;  %s4429_s0 = inlined_call_operand.vmem [shape: f32[8,64,32], index: 0, kind: input, shape index: {}]   ;;  %s4430_s1 = inlined_call_operand.vmem [shape: f32[30,32], index: 1, kind: input, shape index: {}]   ;;  %s4431_s2 = inlined_call_operand.vmem [shape: f32[16,64], index: 2, kind: input, shape index: {}]   ;;  %s4432_s3 = inlined_call_operand.hbm [shape: f32[8,64,64], index: 3, kind: output, shape index: {}]  }
   0x1   :  { %10 = vsyncpa [#allocation3 + $0x1], 0  ;;  %s2596_s12 = smov 0   ;;  %s2598_s13 = smov 0  }
   0x2   :  { %s2600_s14 = smov 0   ;;  %s2602_s15 = smov 0  }
   0x3 LB: > { %s2617_s16 = sadd.s32 4294967295, %s2562_s15   ;;  %s2171_s17 = sadd.s32 4294967294, %s2562_s15   ;;  %s2562_s15 = sphi %s2602_s15, %s4750_s15   ;;  %s2558_s14 = sphi %s2600_s14, %s4749_s14   ;;  %s2554_s13 = sphi %s2598_s13, %s4748_s13   ;;  %s2550_s12 = sphi %s2596_s12, %s4747_s12  }
   0x4   : > { %s2621_s18 = sadd.s32 1, %s2562_s15   ;;  %s91_s19 = sadd.s32 1, %s2558_s14 }
   0x5   : > { %s88_s20 = ssub.s32 %s2562_s15, %s2621_s18  ;;  %p101_p0 = scmp.ne.s32.totalorder %s2558_s14, %s2554_s13 }
   0x6   : > { %p89_p1 = scmp.eq.s32.totalorder %s88_s20, 0  ;;  %p102_p2 = scmp.eq.s32.totalorder %s2617_s16, 1 }
   0x7   : > { %p107_p3 = scmp.ne.s32.totalorder %s2554_s13, %s2550_s12  ;;  %p108_p4 = scmp.eq.s32.totalorder %s2171_s17, 1 }
   0x8   : > { %s2632_s21 = scalar_select %p89_p1, %s2558_s14, %s91_s19  }
   0x9   : > { %p2634_p5 = por %p102_p2, %p101_p0  ;;  %p2638_p6 = por %p108_p4, %p107_p3 }
   0xa   : > { %p2174_p7 = scmp.ge.s32.totalorder %s2562_s15, 1  ;;  %p142_p8 = scmp.lt.s32.totalorder %s2562_s15, 3 }
   0xc   : > { %p143_p9 = pnand %p2174_p7, %p142_p8 }
   0xe   : > { %146 = sbr.rel (%p143_p9) target bundleno = 1168 (0x490), region = 32 }
  0x15   : > { %v207_v0 = vld [vmem:[%s4430_s1] sm:$0xff]  ;;  %v208_v1 = vld [vmem:[%s4430_s1 + $0x8] sm:$0xff]  ;;  %vm211_vm0 = vcmask 261120   ;;  %v209_v2 = vld [vmem:[%s4430_s1 + $0x10] sm:$0xff]  ;;  %s2176_s30 = sshll.u32 %s2617_s16, 2  ;;  %s2564_s10 = smov 2  }
  0x16   : > { %v2434_v3 = vpack.c.bf16 %v208_v1, %v207_v0  ;;  %vm2435_vm1 = vmpackc.low %vm211_vm0, %vm211_vm0  ;;  %v210_v4 = vld [vmem:[%s4430_s1 + $0x18] sm:$0x3f]  ;;  %p168_p10 = scmp.lt.s32.totalorder %s2176_s30, 7  ;;  %s2565_s11 = smov 1   ;;  %vm1249_vm2 = vcmask 1040384   ;;  %vm1282_vm3 = vcmask 1041408  }
  0x17   : > { %v2440_v5 = vpack.c.bf16 %v210_v4, %v209_v2  ;;  %s2566_s17 = smov 3   ;;  %s2567_s19 = smov 7   ;;  %vm1315_vm4 = vcmask 1042432   ;;  %vm1348_vm5 = vcmask 1043456   ;;  %vm1381_vm6 = vcmask 1044480  }
  0x18   : > { %2436 = vmatprep.subr.msk.bf16.mxu0 %vm2435_vm1, %v2434_v3  ;;  %s4752_s30 = smov (!%p168_p10, %s2176_s30), 7  ;;  %s2568_s20 = smov 4   ;;  %vm1414_vm7 = vcmask 1045504   ;;  %vm1447_vm8 = vcmask 1046528   ;;  %vm1704_vm9 = vcmask 64512   ;;  %vm1739_vm10 = vcmask 130048  }
  0x19   : > { %2439 = vmatpush3.bf16.xpose.msk.msra.mxu0 %vm2435_vm1, %v2434_v3  ;;  %s2253_s6 = sshll.u32 %s4752_s30, 6  ;;  %s2569_s24 = smov 5   ;;  %vm2061_vm11 = vcmask 523264  }
  0x1a   : > { %2442 = vmatprep.subr.msk.bf16.mxu0 %vm2435_vm1, %v2440_v5  ;;  %s2662_s9 = scalar_lea.vmem %s4429_s0, %s2253_s6  ;;  %s2570_s25 = smov 6  }
  0x1b   : > { %v175_v6 = vld [vmem:[%s2662_s9] sm:$0xff]  ;;  %v176_v7 = vld [vmem:[%s2662_s9 + $0x8] sm:$0xff]  ;;  %v177_v8 = vld [vmem:[%s2662_s9 + $0x10] sm:$0xff]  ;;  %s2571_s30 = smov 121   ;;  %s2572_s4 = smov 114  }
  0x1c   : > { %2334 = vmatprep.mubr.msk.f32.mxu0 %vm211_vm0, %v175_v6  ;;  %v178_v9 = vld [vmem:[%s2662_s9 + $0x18] sm:$0xff]  ;;  %v179_v10 = vld [vmem:[%s2662_s9 + $0x20] sm:$0xff]  ;;  %v180_v11 = vld [vmem:[%s2662_s9 + $0x28] sm:$0xff]  ;;  %s164_s5 = sand.u32 1, %s2554_s13   ;;  %s2255_s8 = sshll.u32 %s2617_s16, 12 }
  0x1d   : > { %v181_v12 = vld [vmem:[%s2662_s9 + $0x30] sm:$0xff]  ;;  %v182_v13 = vld [vmem:[%s2662_s9 + $0x38] sm:$0xff]  ;;  %v183_v14 = vld [vmem:[%s2662_s9 + $0x40] sm:$0xff]  ;;  %s2175_s6 = sshll.u32 %s164_s5, 8 }
  0x1e   : > { %v184_v15 = vld [vmem:[%s2662_s9 + $0x48] sm:$0xff]  ;;  %v185_v16 = vld [vmem:[%s2662_s9 + $0x50] sm:$0xff]  ;;  %v186_v17 = vld [vmem:[%s2662_s9 + $0x58] sm:$0xff]  ;;  %s4311_s7 = scalar_lea.vmem [#allocation2], %s2175_s6 }
  0x1f   : > { %v187_v18 = vld [vmem:[%s2662_s9 + $0x60] sm:$0xff]  ;;  %v188_v19 = vld [vmem:[%s2662_s9 + $0x68] sm:$0xff]  ;;  %v189_v20 = vld [vmem:[%s2662_s9 + $0x70] sm:$0xff] }
  0x20   : > { %v190_v21 = vld [vmem:[%s2662_s9 + $0x78] sm:$0xff]  ;;  %v191_v22 = vld [vmem:[%s2662_s9 + $0x80] sm:$0xff]  ;;  %v192_v23 = vld [vmem:[%s2662_s9 + $0x88] sm:$0xff] }
  0x21   : > { %2445 = vmatpush3.bf16.xpose.msk.msra.mxu0 %vm2435_vm1, %v2440_v5  ;;  %v193_v24 = vld [vmem:[%s2662_s9 + $0x90] sm:$0xff]  ;;  %v194_v25 = vld [vmem:[%s2662_s9 + $0x98] sm:$0xff]  ;;  %v195_v26 = vld [vmem:[%s2662_s9 + $0xa0] sm:$0xff] }
  0x22   : > { %v196_v27 = vld [vmem:[%s2662_s9 + $0xa8] sm:$0xff]  ;;  %v197_v28 = vld [vmem:[%s2662_s9 + $0xb0] sm:$0xff]  ;;  %v198_v29 = vld [vmem:[%s2662_s9 + $0xb8] sm:$0xff] }
  0x23   : > { %v199_v30 = vld [vmem:[%s2662_s9 + $0xc0] sm:$0xff]  ;;  %v200_v31 = vld [vmem:[%s2662_s9 + $0xc8] sm:$0xff]  ;;  %v201_v32 = vld [vmem:[%s2662_s9 + $0xd0] sm:$0xff] }
  0x24   : > { %v202_v33 = vld [vmem:[%s2662_s9 + $0xd8] sm:$0xff]  ;;  %v203_v34 = vld [vmem:[%s2662_s9 + $0xe0] sm:$0xff]  ;;  %v204_v35 = vld [vmem:[%s2662_s9 + $0xe8] sm:$0xff] }
  0x25   : > { %v205_v36 = vld [vmem:[%s2662_s9 + $0xf0] sm:$0xff]  ;;  %v206_v37 = vld [vmem:[%s2662_s9 + $0xf8] sm:$0xff]  ;;  %s2109_s9 = sshll.u32 %s4311_s7, 4  ;;  %s4380_s9 = int_to_ptr.vmem [resolvable:$true] %s2109_s9 }
  0x26   : > { %s2500_s16 = scalar_lea.vmem %s4380_s9, 4096 }
  0x27   : > { %p2501_p11 = scmp.ne.s32.totalorder %s4380_s9, %s2500_s16 }
  0x28   : > { %2335 = vmatmul.mubr.msk.f32.vlgmr.msra.gmra.mrb[0].mxu0 %vm211_vm0, %v176_v7 }
  0x29   : > { %2337 = vmatprep.mubr.msk.f32.mxu0 %vm211_vm0, %v177_v8  ;;  %p2502_p12 = pnand %p2501_p11, %p2634_p5 }
  0x2b   : > { %p2503_p13 = pneg %p2502_p12 }
  0x2c   : > { %2338 = vmatmul.mubr.msk.f32.gmra.mrb[2].mxu0 %vm211_vm0, %v178_v9 }
  0x2d   : > { %2340 = vmatprep.mubr.msk.f32.mxu0 %vm211_vm0, %v179_v10 }
  0x30   : > { %2341 = vmatmul.mubr.msk.f32.gmra.mrb[4].mxu0 %vm211_vm0, %v180_v11 }
  0x31   : > { %2343 = vmatprep.mubr.msk.f32.mxu0 %vm211_vm0, %v181_v12 }
  0x34   : > { %2344 = vmatmul.mubr.msk.f32.gmra.mrb[6].mxu0 %vm211_vm0, %v182_v13 }
  0x35   : > { %2346 = vmatprep.mubr.msk.f32.mxu0 %vm211_vm0, %v183_v14 }
  0x38   : > { %2347 = vmatmul.mubr.msk.f32.gmra.mrb[8].mxu0 %vm211_vm0, %v184_v15 }
  0x39   : > { %2349 = vmatprep.mubr.msk.f32.mxu0 %vm211_vm0, %v185_v16 }
  0x3c   : > { %2350 = vmatmul.mubr.msk.f32.gmra.mrb[10].mxu0 %vm211_vm0, %v186_v17 }
  0x3d   : > { %2352 = vmatprep.mubr.msk.f32.mxu0 %vm211_vm0, %v187_v18 }
  0x40   : > { %2353 = vmatmul.mubr.msk.f32.gmra.mrb[12].mxu0 %vm211_vm0, %v188_v19 }
  0x41   : > { %2355 = vmatprep.mubr.msk.f32.mxu0 %vm211_vm0, %v189_v20 }
  0x44   : > { %2356 = vmatmul.mubr.msk.f32.gmra.mrb[14].mxu0 %vm211_vm0, %v190_v21 }
  0x45   : > { %2358 = vmatprep.mubr.msk.f32.mxu0 %vm211_vm0, %v191_v22 }
  0x48   : > { %2359 = vmatmul.mubr.msk.f32.gmra.mrb[16].mxu0 %vm211_vm0, %v192_v23 }
  0x49   : > { %2361 = vmatprep.mubr.msk.f32.mxu0 %vm211_vm0, %v193_v24 }
  0x4c   : > { %2362 = vmatmul.mubr.msk.f32.gmra.mrb[18].mxu0 %vm211_vm0, %v194_v25 }
  0x4d   : > { %2364 = vmatprep.mubr.msk.f32.mxu0 %vm211_vm0, %v195_v26 }
  0x50   : > { %2365 = vmatmul.mubr.msk.f32.gmra.mrb[20].mxu0 %vm211_vm0, %v196_v27 }
  0x51   : > { %2367 = vmatprep.mubr.msk.f32.mxu0 %vm211_vm0, %v197_v28 }
  0x54   : > { %2368 = vmatmul.mubr.msk.f32.gmra.mrb[22].mxu0 %vm211_vm0, %v198_v29 }
  0x55   : > { %2370 = vmatprep.mubr.msk.f32.mxu0 %vm211_vm0, %v199_v30 }
  0x58   : > { %2371 = vmatmul.mubr.msk.f32.gmra.mrb[24].mxu0 %vm211_vm0, %v200_v31 }
  0x59   : > { %2373 = vmatprep.mubr.msk.f32.mxu0 %vm211_vm0, %v201_v32 }
  0x5c   : > { %2374 = vmatmul.mubr.msk.f32.gmra.mrb[26].mxu0 %vm211_vm0, %v202_v33 }
  0x5d   : > { %2376 = vmatprep.mubr.msk.f32.mxu0 %vm211_vm0, %v203_v34 }
  0x60   : > { %2377 = vmatmul.mubr.msk.f32.gmra.mrb[28].mxu0 %vm211_vm0, %v204_v35 }
  0x61   : > { %2379 = vmatprep.mubr.msk.f32.mxu0 %vm211_vm0, %v205_v36 }
  0x64   : > { %2380 = vmatmul.mubr.msk.f32.gmra.mrb[30].mxu0 %vm211_vm0, %v206_v37 }
  0xfb   : > { %v2728_v38 = vpop.f32.mrb[0].mxu0 }
  0xfc   : > { %675 = vrot.lane.b32.xlu1 %v2728_v38, %s2564_s10  ;;  %579 = vrot.lane.b32.xlu0 %v2728_v38, %s2565_s11  ;;  %v2734_v39 = vpop.f32.mrb[1].mxu0 }
  0xff   : > { %v2736_v40 = vpop.f32.mrb[2].mxu0 }
 0x100   : > { %771 = vrot.lane.b32.xlu1 %v2728_v38, %s2566_s17  ;;  %1155 = vrot.lane.b32.xlu0 %v2728_v38, %s2567_s19  ;;  %v2742_v41 = vpop.f32.mrb[3].mxu0 }
 0x103   : > { %v2744_v42 = vpop.f32.mrb[4].mxu0 }
 0x104   : > { %867 = vrot.lane.b32.xlu1 %v2728_v38, %s2568_s20  ;;  %577 = vrot.lane.b32.xlu0 %v2734_v39, %s2565_s11  ;;  %v2750_v43 = vpop.f32.mrb[5].mxu0 }
 0x107   : > { %v2752_v44 = vpop.f32.mrb[6].mxu0 }
 0x108   : > { %4475 = vst [vmem:[#allocation5_spill] sm:$0xff] %v2752_v44  ;;  %963 = vrot.lane.b32.xlu1 %v2728_v38, %s2569_s24  ;;  %673 = vrot.lane.b32.xlu0 %v2734_v39, %s2564_s10  ;;  %v2758_v45 = vpop.f32.mrb[7].mxu0 }
 0x109   : > { %4476 = vst [vmem:[#allocation6_spill] sm:$0xff] %v2758_v45 }
 0x10b   : > { %v2760_v46 = vpop.f32.mrb[8].mxu0 }
 0x10c   : > { %4477 = vst [vmem:[#allocation7_spill] sm:$0xff] %v2760_v46  ;;  %1059 = vrot.lane.b32.xlu1 %v2728_v38, %s2570_s25  ;;  %769 = vrot.lane.b32.xlu0 %v2734_v39, %s2566_s17  ;;  %v2766_v47 = vpop.f32.mrb[9].mxu0 }
 0x10d   : > { %4478 = vst [vmem:[#allocation8_spill] sm:$0xff] %v2766_v47 }
 0x10f   : > { %v2768_v48 = vpop.f32.mrb[10].mxu0 }
 0x110   : > { %4479 = vst [vmem:[#allocation9_spill] sm:$0xff] %v2768_v48  ;;  %865 = vrot.lane.b32.xlu0 %v2734_v39, %s2568_s20  ;;  %583 = vrot.lane.b32.xlu1 %v2736_v40, %s2565_s11  ;;  %v2774_v49 = vpop.f32.mrb[11].mxu0 }
 0x111   : > { %4480 = vst [vmem:[#allocation10_spill] sm:$0xff] %v2774_v49 }
 0x113   : > { %v2788_v50 = vpop.f32.mrb[12].mxu0 }
 0x114   : > { %961 = vrot.lane.b32.xlu0 %v2734_v39, %s2569_s24  ;;  %679 = vrot.lane.b32.xlu1 %v2736_v40, %s2564_s10  ;;  %4481 = vst [vmem:[#allocation11_spill] sm:$0xff] %v2788_v50  ;;  %v2790_v51 = vpop.f32.mrb[13].mxu0 }
 0x115   : > { %4482 = vst [vmem:[#allocation12_spill] sm:$0xff] %v2790_v51 }
 0x117   : > { %v2820_v52 = vpop.f32.mrb[14].mxu0 }
 0x118   : > { %1057 = vrot.lane.b32.xlu0 %v2734_v39, %s2570_s25  ;;  %775 = vrot.lane.b32.xlu1 %v2736_v40, %s2566_s17  ;;  %4483 = vst [vmem:[#allocation13_spill] sm:$0xff] %v2820_v52  ;;  %v2822_v53 = vpop.f32.mrb[15].mxu0 }
 0x119   : > { %4484 = vst [vmem:[#allocation14_spill] sm:$0xff] %v2822_v53 }
 0x11b   : > { %v2840_v54 = vpop.f32.mrb[16].mxu0 }
 0x11c   : > { %1153 = vrot.lane.b32.xlu0 %v2734_v39, %s2567_s19  ;;  %871 = vrot.lane.b32.xlu1 %v2736_v40, %s2568_s20  ;;  %4485 = vst [vmem:[#allocation15_spill] sm:$0xff] %v2840_v54  ;;  %v2842_v55 = vpop.f32.mrb[17].mxu0 }
 0x11d   : > { %4486 = vst [vmem:[#allocation16_spill] sm:$0xff] %v2842_v55 }
 0x11f   : > { %v2856_v56 = vpop.f32.mrb[18].mxu0 }
 0x120   : > { %1159 = vrot.lane.b32.xlu0 %v2736_v40, %s2567_s19  ;;  %967 = vrot.lane.b32.xlu1 %v2736_v40, %s2569_s24  ;;  %4487 = vst [vmem:[#allocation17_spill] sm:$0xff] %v2856_v56  ;;  %v2858_v57 = vpop.f32.mrb[19].mxu0 }
 0x121   : > { %4488 = vst [vmem:[#allocation18_spill] sm:$0xff] %v2858_v57 }
 0x123   : > { %v2872_v58 = vpop.f32.mrb[20].mxu0 }
 0x124   : > { %1063 = vrot.lane.b32.xlu1 %v2736_v40, %s2570_s25  ;;  %677 = vrot.lane.b32.xlu0 %v2742_v41, %s2564_s10  ;;  %4489 = vst [vmem:[#allocation19_spill] sm:$0xff] %v2872_v58  ;;  %v2874_v59 = vpop.f32.mrb[21].mxu0 }
 0x125   : > { %4490 = vst [vmem:[#allocation20_spill] sm:$0xff] %v2874_v59 }
 0x127   : > { %v2892_v62 = vpop.f32.mrb[22].mxu0 }
 0x128   : > { %773 = vrot.lane.b32.xlu0 %v2742_v41, %s2566_s17  ;;  %581 = vrot.lane.b32.xlu1 %v2742_v41, %s2565_s11  ;;  %4491 = vst [vmem:[#allocation21_spill] sm:$0xff] %v2892_v62  ;;  %v2898_v63 = vpop.f32.mrb[23].mxu0 }
 0x129   : > { %4492 = vst [vmem:[#allocation22_spill] sm:$0xff] %v2898_v63 }
 0x12b   : > { %v2920_v6 = vpop.f32.mrb[24].mxu0 }
 0x12c   : > { %965 = vrot.lane.b32.xlu0 %v2742_v41, %s2569_s24  ;;  %869 = vrot.lane.b32.xlu1 %v2742_v41, %s2568_s20  ;;  %4493 = vst [vmem:[#allocation23_spill] sm:$0xff] %v2920_v6  ;;  %v2926_v7 = vpop.f32.mrb[25].mxu0 }
 0x12d   : > { %4494 = vst [vmem:[#allocation24_spill] sm:$0xff] %v2926_v7 }
 0x12f   : > { %v2948_v14 = vpop.f32.mrb[26].mxu0 }
 0x130   : > { %1061 = vrot.lane.b32.xlu0 %v2742_v41, %s2570_s25  ;;  %587 = vrot.lane.b32.xlu1 %v2744_v42, %s2565_s11  ;;  %4495 = vst [vmem:[#allocation25_spill] sm:$0xff] %v2948_v14  ;;  %v2954_v15 = vpop.f32.mrb[27].mxu0 }
 0x131   : > { %4496 = vst [vmem:[#allocation26_spill] sm:$0xff] %v2954_v15 }
 0x133   : > { %v2968_v20 = vpop.f32.mrb[28].mxu0 }
 0x134   : > { %1157 = vrot.lane.b32.xlu0 %v2742_v41, %s2567_s19  ;;  %683 = vrot.lane.b32.xlu1 %v2744_v42, %s2564_s10  ;;  %4497 = vst [vmem:[#allocation27_spill] sm:$0xff] %v2968_v20  ;;  %v2974_v21 = vpop.f32.mrb[29].mxu0 }
 0x135   : > { %4498 = vst [vmem:[#allocation28_spill] sm:$0xff] %v2974_v21 }
 0x137   : > { %v2988_v26 = vpop.f32.mrb[30].mxu0 }
 0x138   : > { %1163 = vrot.lane.b32.xlu0 %v2744_v42, %s2567_s19  ;;  %779 = vrot.lane.b32.xlu1 %v2744_v42, %s2566_s17  ;;  %v2994_v27 = vpop.f32.mrb[31].mxu0 }
 0x13c   : > { %875 = vrot.lane.b32.xlu1 %v2744_v42, %s2568_s20  ;;  %585 = vrot.lane.b32.xlu0 %v2750_v43, %s2565_s11 }
 0x140   : > { %971 = vrot.lane.b32.xlu1 %v2744_v42, %s2569_s24  ;;  %681 = vrot.lane.b32.xlu0 %v2750_v43, %s2564_s10 }
 0x144   : > { %1067 = vrot.lane.b32.xlu1 %v2744_v42, %s2570_s25  ;;  %777 = vrot.lane.b32.xlu0 %v2750_v43, %s2566_s17 }
 0x148   : > { %873 = vrot.lane.b32.xlu1 %v2750_v43, %s2568_s20  ;;  %969 = vrot.lane.b32.xlu0 %v2750_v43, %s2569_s24 }
 0x14c   : > { %1065 = vrot.lane.b32.xlu0 %v2750_v43, %s2570_s25  ;;  %591 = vrot.lane.b32.xlu1 %v2752_v44, %s2565_s11 }
 0x150   : > { %1161 = vrot.lane.b32.xlu0 %v2750_v43, %s2567_s19  ;;  %687 = vrot.lane.b32.xlu1 %v2752_v44, %s2564_s10 }
 0x154   : > { %1167 = vrot.lane.b32.xlu0 %v2752_v44, %s2567_s19  ;;  %783 = vrot.lane.b32.xlu1 %v2752_v44, %s2566_s17 }
 0x158   : > { %879 = vrot.lane.b32.xlu1 %v2752_v44, %s2568_s20  ;;  %589 = vrot.lane.b32.xlu0 %v2758_v45, %s2565_s11 }
 0x15c   : > { %975 = vrot.lane.b32.xlu1 %v2752_v44, %s2569_s24  ;;  %685 = vrot.lane.b32.xlu0 %v2758_v45, %s2564_s10 }
 0x160   : > { %1071 = vrot.lane.b32.xlu1 %v2752_v44, %s2570_s25  ;;  %781 = vrot.lane.b32.xlu0 %v2758_v45, %s2566_s17 }
 0x164   : > { %877 = vrot.lane.b32.xlu1 %v2758_v45, %s2568_s20  ;;  %973 = vrot.lane.b32.xlu0 %v2758_v45, %s2569_s24 }
 0x168   : > { %1069 = vrot.lane.b32.xlu0 %v2758_v45, %s2570_s25  ;;  %595 = vrot.lane.b32.xlu1 %v2760_v46, %s2565_s11 }
 0x16c   : > { %1165 = vrot.lane.b32.xlu0 %v2758_v45, %s2567_s19  ;;  %691 = vrot.lane.b32.xlu1 %v2760_v46, %s2564_s10 }
 0x16e   : > { %v2888_v60 = vpop.permute.xlu1 %675  ;;  %v2890_v61 = vpop.permute.xlu0 %579 }
 0x170   : > { %1171 = vrot.lane.b32.xlu0 %v2760_v46, %s2567_s19  ;;  %787 = vrot.lane.b32.xlu1 %v2760_v46, %s2566_s17 }
 0x172   : > { %v2900_v0 = vpop.permute.xlu1 %771  ;;  %v2902_v1 = vpop.permute.xlu0 %1155 }
 0x174   : > { %883 = vrot.lane.b32.xlu1 %v2760_v46, %s2568_s20  ;;  %593 = vrot.lane.b32.xlu0 %v2766_v47, %s2565_s11 }
 0x176   : > { %v2908_v2 = vpop.permute.xlu1 %867  ;;  %v2910_v3 = vpop.permute.xlu0 %577 }
 0x178   : > { %979 = vrot.lane.b32.xlu1 %v2760_v46, %s2569_s24  ;;  %689 = vrot.lane.b32.xlu0 %v2766_v47, %s2564_s10 }
 0x17a   : > { %v2916_v4 = vpop.permute.xlu1 %963  ;;  %v2918_v5 = vpop.permute.xlu0 %673 }
 0x17c   : > { %1075 = vrot.lane.b32.xlu1 %v2760_v46, %s2570_s25  ;;  %785 = vrot.lane.b32.xlu0 %v2766_v47, %s2566_s17 }
 0x17e   : > { %v2928_v8 = vpop.permute.xlu1 %1059  ;;  %v2930_v9 = vpop.permute.xlu0 %769 }
 0x180   : > { %881 = vrot.lane.b32.xlu1 %v2766_v47, %s2568_s20  ;;  %977 = vrot.lane.b32.xlu0 %v2766_v47, %s2569_s24 }
 0x182   : > { %v2936_v10 = vpop.permute.xlu0 %865  ;;  %v2938_v11 = vpop.permute.xlu1 %583 }
 0x184   : > { %1073 = vrot.lane.b32.xlu0 %v2766_v47, %s2570_s25  ;;  %599 = vrot.lane.b32.xlu1 %v2768_v48, %s2565_s11 }
 0x186   : > { %v2944_v12 = vpop.permute.xlu0 %961  ;;  %v2946_v13 = vpop.permute.xlu1 %679 }
 0x188   : > { %1169 = vrot.lane.b32.xlu0 %v2766_v47, %s2567_s19  ;;  %695 = vrot.lane.b32.xlu1 %v2768_v48, %s2564_s10 }
 0x18a   : > { %v2956_v16 = vpop.permute.xlu0 %1057  ;;  %v2958_v17 = vpop.permute.xlu1 %775 }
 0x18c   : > { %1175 = vrot.lane.b32.xlu0 %v2768_v48, %s2567_s19  ;;  %791 = vrot.lane.b32.xlu1 %v2768_v48, %s2566_s17 }
 0x18e   : > { %v2964_v18 = vpop.permute.xlu0 %1153  ;;  %v2966_v19 = vpop.permute.xlu1 %871 }
 0x190   : > { %887 = vrot.lane.b32.xlu1 %v2768_v48, %s2568_s20  ;;  %597 = vrot.lane.b32.xlu0 %v2774_v49, %s2565_s11 }
 0x192   : > { %v2976_v22 = vpop.permute.xlu0 %1159  ;;  %v2978_v23 = vpop.permute.xlu1 %967 }
 0x194   : > { %983 = vrot.lane.b32.xlu1 %v2768_v48, %s2569_s24  ;;  %693 = vrot.lane.b32.xlu0 %v2774_v49, %s2564_s10 }
 0x196   : > { %v2984_v24 = vpop.permute.xlu1 %1063  ;;  %v2986_v25 = vpop.permute.xlu0 %677 }
 0x198   : > { %1079 = vrot.lane.b32.xlu1 %v2768_v48, %s2570_s25  ;;  %789 = vrot.lane.b32.xlu0 %v2774_v49, %s2566_s17 }
 0x19a   : > { %v2996_v28 = vpop.permute.xlu0 %773  ;;  %v2998_v29 = vpop.permute.xlu1 %581 }
 0x19c   : > { %885 = vrot.lane.b32.xlu1 %v2774_v49, %s2568_s20  ;;  %981 = vrot.lane.b32.xlu0 %v2774_v49, %s2569_s24 }
 0x19e   : > { %v3004_v30 = vpop.permute.xlu0 %965  ;;  %v3006_v31 = vpop.permute.xlu1 %869 }
 0x1a0   : > { %1077 = vrot.lane.b32.xlu0 %v2774_v49, %s2570_s25  ;;  %603 = vrot.lane.b32.xlu1 %v2788_v50, %s2565_s11 }
 0x1a2   : > { %v3012_v32 = vpop.permute.xlu0 %1061  ;;  %v3014_v33 = vpop.permute.xlu1 %587 }
 0x1a4   : > { %1173 = vrot.lane.b32.xlu0 %v2774_v49, %s2567_s19  ;;  %699 = vrot.lane.b32.xlu1 %v2788_v50, %s2564_s10 }
 0x1a6   : > { %v3020_v34 = vpop.permute.xlu0 %1157  ;;  %v3022_v35 = vpop.permute.xlu1 %683 }
 0x1a8   : > { %1179 = vrot.lane.b32.xlu0 %v2788_v50, %s2567_s19  ;;  %795 = vrot.lane.b32.xlu1 %v2788_v50, %s2566_s17 }
 0x1aa   : > { %v3028_v36 = vpop.permute.xlu0 %1163  ;;  %v3030_v37 = vpop.permute.xlu1 %779 }
 0x1ab   : > { %4499 = vst [vmem:[#allocation29_spill] sm:$0xff] %v3028_v36  ;;  %4500 = vst [vmem:[#allocation30_spill] sm:$0xff] %v3030_v37 }
 0x1ac   : > { %891 = vrot.lane.b32.xlu1 %v2788_v50, %s2568_s20  ;;  %601 = vrot.lane.b32.xlu0 %v2790_v51, %s2565_s11 }
 0x1ae   : > { %v3036_v48 = vpop.permute.xlu1 %875  ;;  %v3038_v49 = vpop.permute.xlu0 %585 }
 0x1af   : > { %4501 = vst [vmem:[#allocation31_spill] sm:$0xff] %v3036_v48 }
 0x1b0   : > { %987 = vrot.lane.b32.xlu1 %v2788_v50, %s2569_s24  ;;  %697 = vrot.lane.b32.xlu0 %v2790_v51, %s2564_s10 }
 0x1b2   : > { %v3044_v46 = vpop.permute.xlu1 %971  ;;  %v3046_v47 = vpop.permute.xlu0 %681 }
 0x1b3   : > { %4502 = vst [vmem:[#allocation32_spill] sm:$0xff] %v3044_v46 }
 0x1b4   : > { %1083 = vrot.lane.b32.xlu1 %v2788_v50, %s2570_s25  ;;  %793 = vrot.lane.b32.xlu0 %v2790_v51, %s2566_s17 }
 0x1b6   : > { %v3052_v36 = vpop.permute.xlu1 %1067  ;;  %v3054_v44 = vpop.permute.xlu0 %777 }
 0x1b7   : > { %4503 = vst [vmem:[#allocation33_spill] sm:$0xff] %v3052_v36 }
 0x1b8   : > { %889 = vrot.lane.b32.xlu1 %v2790_v51, %s2568_s20  ;;  %985 = vrot.lane.b32.xlu0 %v2790_v51, %s2569_s24 }
 0x1ba   : > { %v3060_v45 = vpop.permute.xlu1 %873  ;;  %v3062_v46 = vpop.permute.xlu0 %969 }
 0x1bb   : > { %4504 = vst [vmem:[#allocation34_spill] sm:$0xff] %v3062_v46 }
 0x1bc   : > { %1081 = vrot.lane.b32.xlu0 %v2790_v51, %s2570_s25  ;;  %607 = vrot.lane.b32.xlu1 %v2820_v52, %s2565_s11 }
 0x1be   : > { %v3068_v50 = vpop.permute.xlu0 %1065  ;;  %v3070_v36 = vpop.permute.xlu1 %591 }
 0x1bf   : > { %4505 = vst [vmem:[#allocation35_spill] sm:$0xff] %v3068_v50  ;;  %4506 = vst [vmem:[#allocation36_spill] sm:$0xff] %v3070_v36 }
 0x1c0   : > { %1177 = vrot.lane.b32.xlu0 %v2790_v51, %s2567_s19  ;;  %703 = vrot.lane.b32.xlu1 %v2820_v52, %s2564_s10 }
 0x1c2   : > { %v3076_v48 = vpop.permute.xlu0 %1161  ;;  %v3078_v37 = vpop.permute.xlu1 %687 }
 0x1c3   : > { %4507 = vst [vmem:[#allocation37_spill] sm:$0xff] %v3078_v37 }
 0x1c4   : > { %799 = vrot.lane.b32.xlu1 %v2820_v52, %s2566_s17  ;;  %605 = vrot.lane.b32.xlu0 %v2822_v53, %s2565_s11 }
 0x1c6   : > { %v3084_v46 = vpop.permute.xlu0 %1167  ;;  %v3086_v50 = vpop.permute.xlu1 %783 }
 0x1c7   : > { %4508 = vst [vmem:[#allocation38_spill] sm:$0xff] %v3084_v46  ;;  %4509 = vst [vmem:[#allocation39_spill] sm:$0xff] %v3086_v50 }
 0x1c8   : > { %893 = vrot.lane.b32.xlu1 %v2822_v53, %s2568_s20  ;;  %701 = vrot.lane.b32.xlu0 %v2822_v53, %s2564_s10 }
 0x1ca   : > { %v3092_v51 = vpop.permute.xlu1 %879  ;;  %v3094_v36 = vpop.permute.xlu0 %589 }
 0x1cb   : > { %4510 = vst [vmem:[#allocation40_spill] sm:$0xff] %v3092_v51  ;;  %4511 = vst [vmem:[#allocation41_spill] sm:$0xff] %v3094_v36 }
 0x1cc   : > { %797 = vrot.lane.b32.xlu0 %v2822_v53, %s2566_s17  ;;  %611 = vrot.lane.b32.xlu1 %v2840_v54, %s2565_s11 }
 0x1ce   : > { %v3100_v37 = vpop.permute.xlu1 %975  ;;  %v3102_v46 = vpop.permute.xlu0 %685 }
 0x1cf   : > { %4512 = vst [vmem:[#allocation42_spill] sm:$0xff] %v3100_v37  ;;  %4513 = vst [vmem:[#allocation43_spill] sm:$0xff] %v3102_v46 }
 0x1d0   : > { %707 = vrot.lane.b32.xlu1 %v2840_v54, %s2564_s10  ;;  %609 = vrot.lane.b32.xlu0 %v2842_v55, %s2565_s11 }
 0x1d2   : > { %v3108_v50 = vpop.permute.xlu1 %1071  ;;  %v3110_v51 = vpop.permute.xlu0 %781 }
 0x1d3   : > { %4514 = vst [vmem:[#allocation44_spill] sm:$0xff] %v3108_v50  ;;  %4515 = vst [vmem:[#allocation45_spill] sm:$0xff] %v3110_v51 }
 0x1d4   : > { %803 = vrot.lane.b32.xlu1 %v2840_v54, %s2566_s17  ;;  %705 = vrot.lane.b32.xlu0 %v2842_v55, %s2564_s10 }
 0x1d6   : > { %v3116_v36 = vpop.permute.xlu1 %877  ;;  %v3118_v37 = vpop.permute.xlu0 %973 }
 0x1d7   : > { %4516 = vst [vmem:[#allocation46_spill] sm:$0xff] %v3116_v36  ;;  %4517 = vst [vmem:[#allocation47_spill] sm:$0xff] %v3118_v37 }
 0x1d8   : > { %801 = vrot.lane.b32.xlu0 %v2842_v55, %s2566_s17  ;;  %615 = vrot.lane.b32.xlu1 %v2856_v56, %s2565_s11 }
 0x1da   : > { %v3124_v46 = vpop.permute.xlu0 %1069  ;;  %v3126_v50 = vpop.permute.xlu1 %595 }
 0x1db   : > { %4518 = vst [vmem:[#allocation48_spill] sm:$0xff] %v3124_v46  ;;  %4519 = vst [vmem:[#allocation49_spill] sm:$0xff] %v3126_v50 }
 0x1dc   : > { %711 = vrot.lane.b32.xlu1 %v2856_v56, %s2564_s10  ;;  %613 = vrot.lane.b32.xlu0 %v2858_v57, %s2565_s11 }
 0x1de   : > { %v3132_v51 = vpop.permute.xlu0 %1165  ;;  %v3134_v36 = vpop.permute.xlu1 %691 }
 0x1df   : > { %4520 = vst [vmem:[#allocation50_spill] sm:$0xff] %v3132_v51  ;;  %4521 = vst [vmem:[#allocation51_spill] sm:$0xff] %v3134_v36 }
 0x1e0   : > { %807 = vrot.lane.b32.xlu1 %v2856_v56, %s2566_s17  ;;  %709 = vrot.lane.b32.xlu0 %v2858_v57, %s2564_s10 }
 0x1e2   : > { %v3140_v37 = vpop.permute.xlu0 %1171  ;;  %v3142_v46 = vpop.permute.xlu1 %787 }
 0x1e3   : > { %4522 = vst [vmem:[#allocation52_spill] sm:$0xff] %v3140_v37  ;;  %4523 = vst [vmem:[#allocation53_spill] sm:$0xff] %v3142_v46 }
 0x1e4   : > { %805 = vrot.lane.b32.xlu0 %v2858_v57, %s2566_s17  ;;  %619 = vrot.lane.b32.xlu1 %v2872_v58, %s2565_s11 }
 0x1e6   : > { %v3148_v50 = vpop.permute.xlu1 %883  ;;  %v3150_v51 = vpop.permute.xlu0 %593 }
 0x1e7   : > { %4524 = vst [vmem:[#allocation54_spill] sm:$0xff] %v3148_v50  ;;  %4525 = vst [vmem:[#allocation55_spill] sm:$0xff] %v3150_v51 }
 0x1e8   : > { %715 = vrot.lane.b32.xlu1 %v2872_v58, %s2564_s10  ;;  %617 = vrot.lane.b32.xlu0 %v2874_v59, %s2565_s11 }
 0x1ea   : > { %v3156_v36 = vpop.permute.xlu1 %979  ;;  %v3158_v37 = vpop.permute.xlu0 %689 }
 0x1eb   : > { %4526 = vst [vmem:[#allocation56_spill] sm:$0xff] %v3156_v36  ;;  %4527 = vst [vmem:[#allocation57_spill] sm:$0xff] %v3158_v37 }
 0x1ec   : > { %811 = vrot.lane.b32.xlu1 %v2872_v58, %s2566_s17  ;;  %713 = vrot.lane.b32.xlu0 %v2874_v59, %s2564_s10 }
 0x1ee   : > { %v3164_v46 = vpop.permute.xlu1 %1075  ;;  %v3166_v50 = vpop.permute.xlu0 %785 }
 0x1ef   : > { %4528 = vst [vmem:[#allocation58_spill] sm:$0xff] %v3164_v46  ;;  %4529 = vst [vmem:[#allocation59_spill] sm:$0xff] %v3166_v50 }
 0x1f0   : > { %809 = vrot.lane.b32.xlu0 %v2874_v59, %s2566_s17  ;;  %623 = vrot.lane.b32.xlu1 %v2892_v62, %s2565_s11 }
 0x1f2   : > { %v3172_v51 = vpop.permute.xlu1 %881  ;;  %v3174_v36 = vpop.permute.xlu0 %977 }
 0x1f3   : > { %4530 = vst [vmem:[#allocation60_spill] sm:$0xff] %v3172_v51  ;;  %4531 = vst [vmem:[#allocation61_spill] sm:$0xff] %v3174_v36 }
 0x1f4   : > { %719 = vrot.lane.b32.xlu1 %v2892_v62, %s2564_s10  ;;  %621 = vrot.lane.b32.xlu0 %v2898_v63, %s2565_s11 }
 0x1f6   : > { %v3180_v37 = vpop.permute.xlu0 %1073  ;;  %v3182_v46 = vpop.permute.xlu1 %599 }
 0x1f7   : > { %4532 = vst [vmem:[#allocation62_spill] sm:$0xff] %v3180_v37  ;;  %4533 = vst [vmem:[#allocation63_spill] sm:$0xff] %v3182_v46 }
 0x1f8   : > { %815 = vrot.lane.b32.xlu1 %v2892_v62, %s2566_s17  ;;  %717 = vrot.lane.b32.xlu0 %v2898_v63, %s2564_s10 }
 0x1fa   : > { %v3188_v50 = vpop.permute.xlu0 %1169  ;;  %v3190_v51 = vpop.permute.xlu1 %695 }
 0x1fb   : > { %4534 = vst [vmem:[#allocation64_spill] sm:$0xff] %v3188_v50  ;;  %4535 = vst [vmem:[#allocation65_spill] sm:$0xff] %v3190_v51 }
 0x1fc   : > { %813 = vrot.lane.b32.xlu0 %v2898_v63, %s2566_s17  ;;  %627 = vrot.lane.b32.xlu1 %v2920_v6, %s2565_s11 }
 0x1fe   : > { %v3196_v36 = vpop.permute.xlu0 %1175  ;;  %v3198_v37 = vpop.permute.xlu1 %791 }
 0x1ff   : > { %4536 = vst [vmem:[#allocation66_spill] sm:$0xff] %v3196_v36  ;;  %4537 = vst [vmem:[#allocation67_spill] sm:$0xff] %v3198_v37 }
 0x200   : > { %723 = vrot.lane.b32.xlu1 %v2920_v6, %s2564_s10  ;;  %625 = vrot.lane.b32.xlu0 %v2926_v7, %s2565_s11 }
 0x202   : > { %v3204_v46 = vpop.permute.xlu1 %887  ;;  %v3206_v50 = vpop.permute.xlu0 %597 }
 0x203   : > { %4538 = vst [vmem:[#allocation68_spill] sm:$0xff] %v3204_v46  ;;  %4539 = vst [vmem:[#allocation69_spill] sm:$0xff] %v3206_v50 }
 0x204   : > { %819 = vrot.lane.b32.xlu1 %v2920_v6, %s2566_s17  ;;  %721 = vrot.lane.b32.xlu0 %v2926_v7, %s2564_s10 }
 0x206   : > { %v3212_v51 = vpop.permute.xlu1 %983  ;;  %v3214_v36 = vpop.permute.xlu0 %693 }
 0x207   : > { %4540 = vst [vmem:[#allocation70_spill] sm:$0xff] %v3212_v51  ;;  %4541 = vst [vmem:[#allocation71_spill] sm:$0xff] %v3214_v36 }
 0x208   : > { %817 = vrot.lane.b32.xlu0 %v2926_v7, %s2566_s17  ;;  %631 = vrot.lane.b32.xlu1 %v2948_v14, %s2565_s11 }
 0x20a   : > { %v3220_v37 = vpop.permute.xlu1 %1079  ;;  %v3222_v46 = vpop.permute.xlu0 %789 }
 0x20b   : > { %4542 = vst [vmem:[#allocation72_spill] sm:$0xff] %v3220_v37  ;;  %4543 = vst [vmem:[#allocation73_spill] sm:$0xff] %v3222_v46 }
 0x20c   : > { %727 = vrot.lane.b32.xlu1 %v2948_v14, %s2564_s10  ;;  %629 = vrot.lane.b32.xlu0 %v2954_v15, %s2565_s11 }
 0x20e   : > { %v3228_v50 = vpop.permute.xlu1 %885  ;;  %v3230_v51 = vpop.permute.xlu0 %981 }
 0x20f   : > { %4544 = vst [vmem:[#allocation74_spill] sm:$0xff] %v3228_v50  ;;  %4545 = vst [vmem:[#allocation75_spill] sm:$0xff] %v3230_v51 }
 0x210   : > { %725 = vrot.lane.b32.xlu0 %v2954_v15, %s2564_s10  ;;  %635 = vrot.lane.b32.xlu1 %v2968_v20, %s2565_s11 }
 0x212   : > { %v3236_v36 = vpop.permute.xlu0 %1077  ;;  %v3238_v37 = vpop.permute.xlu1 %603 }
 0x213   : > { %4546 = vst [vmem:[#allocation76_spill] sm:$0xff] %v3236_v36  ;;  %4547 = vst [vmem:[#allocation77_spill] sm:$0xff] %v3238_v37 }
 0x214   : > { %731 = vrot.lane.b32.xlu1 %v2968_v20, %s2564_s10  ;;  %633 = vrot.lane.b32.xlu0 %v2974_v21, %s2565_s11 }
 0x216   : > { %v3244_v46 = vpop.permute.xlu0 %1173  ;;  %v3246_v50 = vpop.permute.xlu1 %699 }
 0x217   : > { %4548 = vst [vmem:[#allocation78_spill] sm:$0xff] %v3244_v46  ;;  %4549 = vst [vmem:[#allocation79_spill] sm:$0xff] %v3246_v50 }
 0x218   : > { %729 = vrot.lane.b32.xlu0 %v2974_v21, %s2564_s10  ;;  %639 = vrot.lane.b32.xlu1 %v2988_v26, %s2565_s11 }
 0x21a   : > { %v3252_v51 = vpop.permute.xlu0 %1179  ;;  %v3254_v36 = vpop.permute.xlu1 %795 }
 0x21b   : > { %4550 = vst [vmem:[#allocation80_spill] sm:$0xff] %v3252_v51  ;;  %4551 = vst [vmem:[#allocation81_spill] sm:$0xff] %v3254_v36 }
 0x21c   : > { %735 = vrot.lane.b32.xlu1 %v2988_v26, %s2564_s10  ;;  %637 = vrot.lane.b32.xlu0 %v2994_v27, %s2565_s11 }
 0x21e   : > { %v3260_v37 = vpop.permute.xlu1 %891  ;;  %v3262_v46 = vpop.permute.xlu0 %601 }
 0x21f   : > { %4552 = vst [vmem:[#allocation82_spill] sm:$0xff] %v3260_v37  ;;  %4553 = vst [vmem:[#allocation83_spill] sm:$0xff] %v3262_v46 }
 0x220   : > { %895 = vrot.lane.b32.xlu1 %v2820_v52, %s2568_s20  ;;  %733 = vrot.lane.b32.xlu0 %v2994_v27, %s2564_s10 }
 0x222   : > { %v3268_v50 = vpop.permute.xlu1 %987  ;;  %v3270_v51 = vpop.permute.xlu0 %697 }
 0x223   : > { %4554 = vst [vmem:[#allocation84_spill] sm:$0xff] %v3268_v50  ;;  %4555 = vst [vmem:[#allocation85_spill] sm:$0xff] %v3270_v51 }
 0x224   : > { %991 = vrot.lane.b32.xlu1 %v2820_v52, %s2569_s24  ;;  %989 = vrot.lane.b32.xlu0 %v2822_v53, %s2569_s24 }
 0x226   : > { %v3276_v36 = vpop.permute.xlu1 %1083  ;;  %v3278_v37 = vpop.permute.xlu0 %793 }
 0x227   : > { %4556 = vst [vmem:[#allocation86_spill] sm:$0xff] %v3276_v36  ;;  %4557 = vst [vmem:[#allocation87_spill] sm:$0xff] %v3278_v37 }
 0x228   : > { %1087 = vrot.lane.b32.xlu1 %v2820_v52, %s2570_s25  ;;  %1085 = vrot.lane.b32.xlu0 %v2822_v53, %s2570_s25 }
 0x22a   : > { %v3284_v46 = vpop.permute.xlu1 %889  ;;  %v3286_v50 = vpop.permute.xlu0 %985 }
 0x22b   : > { %4558 = vst [vmem:[#allocation88_spill] sm:$0xff] %v3284_v46 }
 0x22c   : > { %897 = vrot.lane.b32.xlu1 %v2842_v55, %s2568_s20  ;;  %1181 = vrot.lane.b32.xlu0 %v2822_v53, %s2567_s19 }
 0x22e   : > { %v3292_v51 = vpop.permute.xlu0 %1081  ;;  %v3294_v36 = vpop.permute.xlu1 %607 }
 0x22f   : > { %4559 = vst [vmem:[#allocation89_spill] sm:$0xff] %v3292_v51  ;;  %4560 = vst [vmem:[#allocation90_spill] sm:$0xff] %v3294_v36 }
 0x230   : > { %899 = vrot.lane.b32.xlu1 %v2840_v54, %s2568_s20  ;;  %1183 = vrot.lane.b32.xlu0 %v2820_v52, %s2567_s19 }
 0x232   : > { %v3300_v37 = vpop.permute.xlu0 %1177  ;;  %v3302_v46 = vpop.permute.xlu1 %703 }
 0x233   : > { %4561 = vst [vmem:[#allocation91_spill] sm:$0xff] %v3302_v46 }
 0x234   : > { %995 = vrot.lane.b32.xlu1 %v2840_v54, %s2569_s24  ;;  %993 = vrot.lane.b32.xlu0 %v2842_v55, %s2569_s24 }
 0x236   : > { %v3308_v53 = vpop.permute.xlu1 %799  ;;  %v3310_v51 = vpop.permute.xlu0 %605 }
 0x237   : > { %4562 = vst [vmem:[#allocation92_spill] sm:$0xff] %v3308_v53  ;;  %4563 = vst [vmem:[#allocation93_spill] sm:$0xff] %v3310_v51 }
 0x238   : > { %1091 = vrot.lane.b32.xlu1 %v2840_v54, %s2570_s25  ;;  %1089 = vrot.lane.b32.xlu0 %v2842_v55, %s2570_s25 }
 0x23a   : > { %v3316_v52 = vpop.permute.xlu1 %893  ;;  %v3318_v36 = vpop.permute.xlu0 %701 }
 0x23b   : > { %4564 = vst [vmem:[#allocation94_spill] sm:$0xff] %v3316_v52 }
 0x23c   : > { %901 = vrot.lane.b32.xlu1 %v2858_v57, %s2568_s20  ;;  %1185 = vrot.lane.b32.xlu0 %v2842_v55, %s2567_s19 }
 0x23e   : > { %v3324_v46 = vpop.permute.xlu0 %797  ;;  %v3326_v53 = vpop.permute.xlu1 %611 }
 0x23f   : > { %4565 = vst [vmem:[#allocation95_spill] sm:$0xff] %v3324_v46  ;;  %4566 = vst [vmem:[#allocation96_spill] sm:$0xff] %v3326_v53 }
 0x240   : > { %903 = vrot.lane.b32.xlu1 %v2856_v56, %s2568_s20  ;;  %1187 = vrot.lane.b32.xlu0 %v2840_v54, %s2567_s19 }
 0x242   : > { %v3332_v51 = vpop.permute.xlu1 %707  ;;  %v3334_v52 = vpop.permute.xlu0 %609 }
 0x243   : > { %4567 = vst [vmem:[#allocation97_spill] sm:$0xff] %v3332_v51 }
 0x244   : > { %999 = vrot.lane.b32.xlu1 %v2856_v56, %s2569_s24  ;;  %997 = vrot.lane.b32.xlu0 %v2858_v57, %s2569_s24 }
 0x246   : > { %v3340_v55 = vpop.permute.xlu1 %803  ;;  %v3342_v46 = vpop.permute.xlu0 %705 }
 0x247   : > { %4568 = vst [vmem:[#allocation98_spill] sm:$0xff] %v3340_v55  ;;  %4569 = vst [vmem:[#allocation99_spill] sm:$0xff] %v3342_v46 }
 0x248   : > { %1095 = vrot.lane.b32.xlu1 %v2856_v56, %s2570_s25  ;;  %1093 = vrot.lane.b32.xlu0 %v2858_v57, %s2570_s25 }
 0x24a   : > { %v3348_v54 = vpop.permute.xlu0 %801  ;;  %v3350_v51 = vpop.permute.xlu1 %615 }
 0x24b   : > { %4570 = vst [vmem:[#allocation100_spill] sm:$0xff] %v3348_v54  ;;  %4571 = vst [vmem:[#allocation101_spill] sm:$0xff] %v3350_v51 }
 0x24c   : > { %905 = vrot.lane.b32.xlu1 %v2874_v59, %s2568_s20  ;;  %1189 = vrot.lane.b32.xlu0 %v2858_v57, %s2567_s19 }
 0x24e   : > { %v3356_v53 = vpop.permute.xlu1 %711  ;;  %v3358_v55 = vpop.permute.xlu0 %613 }
 0x24f   : > { %4572 = vst [vmem:[#allocation102_spill] sm:$0xff] %v3356_v53  ;;  %4573 = vst [vmem:[#allocation103_spill] sm:$0xff] %v3358_v55  ;;  %v1737_v55 = vld [vmem:[%s4431_s2] sm:$0xff] }
 0x250   : > { %907 = vrot.lane.b32.xlu1 %v2872_v58, %s2568_s20  ;;  %1191 = vrot.lane.b32.xlu0 %v2856_v56, %s2567_s19 }
 0x252   : > { %v3364_v46 = vpop.permute.xlu1 %807  ;;  %v3366_v54 = vpop.permute.xlu0 %709 }
 0x253   : > { %4574 = vst [vmem:[#allocation104_spill] sm:$0xff] %v3364_v46  ;;  %4575 = vst [vmem:[#allocation105_spill] sm:$0xff] %v3366_v54 }
 0x254   : > { %1003 = vrot.lane.b32.xlu1 %v2872_v58, %s2569_s24  ;;  %1001 = vrot.lane.b32.xlu0 %v2874_v59, %s2569_s24 }
 0x256   : > { %v3372_v51 = vpop.permute.xlu0 %805  ;;  %v3374_v53 = vpop.permute.xlu1 %619 }
 0x257   : > { %4576 = vst [vmem:[#allocation106_spill] sm:$0xff] %v3372_v51  ;;  %4577 = vst [vmem:[#allocation107_spill] sm:$0xff] %v3374_v53 }
 0x258   : > { %1099 = vrot.lane.b32.xlu1 %v2872_v58, %s2570_s25  ;;  %1097 = vrot.lane.b32.xlu0 %v2874_v59, %s2570_s25 }
 0x25a   : > { %v3380_v56 = vpop.permute.xlu1 %715  ;;  %v3382_v46 = vpop.permute.xlu0 %617 }
 0x25b   : > { %4578 = vst [vmem:[#allocation108_spill] sm:$0xff] %v3380_v56  ;;  %4579 = vst [vmem:[#allocation109_spill] sm:$0xff] %v3382_v46 }
 0x25c   : > { %909 = vrot.lane.b32.xlu1 %v2898_v63, %s2568_s20  ;;  %1193 = vrot.lane.b32.xlu0 %v2874_v59, %s2567_s19 }
 0x25e   : > { %v3388_v54 = vpop.permute.xlu1 %811  ;;  %v3390_v51 = vpop.permute.xlu0 %713 }
 0x25f   : > { %4580 = vst [vmem:[#allocation110_spill] sm:$0xff] %v3388_v54  ;;  %4581 = vst [vmem:[#allocation111_spill] sm:$0xff] %v3390_v51 }
 0x260   : > { %911 = vrot.lane.b32.xlu1 %v2892_v62, %s2568_s20  ;;  %1195 = vrot.lane.b32.xlu0 %v2872_v58, %s2567_s19 }
 0x262   : > { %v3396_v53 = vpop.permute.xlu0 %809  ;;  %v3398_v56 = vpop.permute.xlu1 %623 }
 0x263   : > { %4582 = vst [vmem:[#allocation112_spill] sm:$0xff] %v3396_v53  ;;  %4583 = vst [vmem:[#allocation113_spill] sm:$0xff] %v3398_v56 }
 0x264   : > { %1007 = vrot.lane.b32.xlu1 %v2892_v62, %s2569_s24  ;;  %1005 = vrot.lane.b32.xlu0 %v2898_v63, %s2569_s24 }
 0x266   : > { %v3404_v59 = vpop.permute.xlu1 %719  ;;  %v3406_v54 = vpop.permute.xlu0 %621 }
 0x267   : > { %4584 = vst [vmem:[#allocation114_spill] sm:$0xff] %v3404_v59  ;;  %4585 = vst [vmem:[#allocation115_spill] sm:$0xff] %v3406_v54 }
 0x268   : > { %1103 = vrot.lane.b32.xlu1 %v2892_v62, %s2570_s25  ;;  %1101 = vrot.lane.b32.xlu0 %v2898_v63, %s2570_s25 }
 0x26a   : > { %v3412_v58 = vpop.permute.xlu1 %815  ;;  %v3414_v53 = vpop.permute.xlu0 %717 }
 0x26b   : > { %4586 = vst [vmem:[#allocation116_spill] sm:$0xff] %v3412_v58  ;;  %4587 = vst [vmem:[#allocation117_spill] sm:$0xff] %v3414_v53 }
 0x26c   : > { %913 = vrot.lane.b32.xlu1 %v2926_v7, %s2568_s20  ;;  %1197 = vrot.lane.b32.xlu0 %v2898_v63, %s2567_s19 }
 0x26e   : > { %v3420_v56 = vpop.permute.xlu0 %813  ;;  %v3422_v59 = vpop.permute.xlu1 %627 }
 0x26f   : > { %4588 = vst [vmem:[#allocation118_spill] sm:$0xff] %v3420_v56  ;;  %4589 = vst [vmem:[#allocation119_spill] sm:$0xff] %v3422_v59 }
 0x270   : > { %915 = vrot.lane.b32.xlu1 %v2920_v6, %s2568_s20  ;;  %1199 = vrot.lane.b32.xlu0 %v2892_v62, %s2567_s19 }
 0x272   : > { %v3428_v54 = vpop.permute.xlu1 %723  ;;  %v3430_v58 = vpop.permute.xlu0 %625 }
 0x273   : > { %4590 = vst [vmem:[#allocation120_spill] sm:$0xff] %v3428_v54  ;;  %4591 = vst [vmem:[#allocation121_spill] sm:$0xff] %v3430_v58 }
 0x274   : > { %1011 = vrot.lane.b32.xlu1 %v2920_v6, %s2569_s24  ;;  %1009 = vrot.lane.b32.xlu0 %v2926_v7, %s2569_s24 }
 0x276   : > { %v3436_v53 = vpop.permute.xlu1 %819  ;;  %v3438_v56 = vpop.permute.xlu0 %721 }
 0x277   : > { %4592 = vst [vmem:[#allocation122_spill] sm:$0xff] %v3436_v53  ;;  %4593 = vst [vmem:[#allocation123_spill] sm:$0xff] %v3438_v56 }
 0x278   : > { %821 = vrot.lane.b32.xlu1 %v2954_v15, %s2566_s17  ;;  %1105 = vrot.lane.b32.xlu0 %v2926_v7, %s2570_s25 }
 0x27a   : > { %v3444_v59 = vpop.permute.xlu0 %817  ;;  %v3446_v54 = vpop.permute.xlu1 %631 }
 0x27b   : > { %4594 = vst [vmem:[#allocation124_spill] sm:$0xff] %v3444_v59  ;;  %4595 = vst [vmem:[#allocation125_spill] sm:$0xff] %v3446_v54 }
 0x27c   : > { %1201 = vrot.lane.b32.xlu1 %v2926_v7, %s2567_s19  ;;  %1107 = vrot.lane.b32.xlu0 %v2920_v6, %s2570_s25 }
 0x27e   : > { %v3452_v58 = vpop.permute.xlu1 %727  ;;  %v3454_v53 = vpop.permute.xlu0 %629 }
 0x27f   : > { %4596 = vst [vmem:[#allocation126_spill] sm:$0xff] %v3452_v58  ;;  %4597 = vst [vmem:[#allocation127_spill] sm:$0xff] %v3454_v53 }
 0x280   : > { %917 = vrot.lane.b32.xlu1 %v2954_v15, %s2568_s20  ;;  %823 = vrot.lane.b32.xlu0 %v2948_v14, %s2566_s17 }
 0x282   : > { %v3460_v56 = vpop.permute.xlu0 %725  ;;  %v3462_v59 = vpop.permute.xlu1 %635 }
 0x283   : > { %4598 = vst [vmem:[#allocation128_spill] sm:$0xff] %v3460_v56  ;;  %4599 = vst [vmem:[#allocation129_spill] sm:$0xff] %v3462_v59 }
 0x284   : > { %919 = vrot.lane.b32.xlu1 %v2948_v14, %s2568_s20  ;;  %1203 = vrot.lane.b32.xlu0 %v2920_v6, %s2567_s19 }
 0x286   : > { %v3468_v54 = vpop.permute.xlu1 %731  ;;  %v3470_v58 = vpop.permute.xlu0 %633 }
 0x287   : > { %4600 = vst [vmem:[#allocation130_spill] sm:$0xff] %v3468_v54  ;;  %4601 = vst [vmem:[#allocation131_spill] sm:$0xff] %v3470_v58 }
 0x288   : > { %1015 = vrot.lane.b32.xlu1 %v2948_v14, %s2569_s24  ;;  %1013 = vrot.lane.b32.xlu0 %v2954_v15, %s2569_s24 }
 0x28a   : > { %v3476_v53 = vpop.permute.xlu0 %729  ;;  %v3478_v56 = vpop.permute.xlu1 %639 }
 0x28b   : > { %4602 = vst [vmem:[#allocation132_spill] sm:$0xff] %v3476_v53  ;;  %4603 = vst [vmem:[#allocation133_spill] sm:$0xff] %v3478_v56 }
 0x28c   : > { %825 = vrot.lane.b32.xlu1 %v2974_v21, %s2566_s17  ;;  %1109 = vrot.lane.b32.xlu0 %v2954_v15, %s2570_s25 }
 0x28e   : > { %v3484_v59 = vpop.permute.xlu1 %735  ;;  %v3486_v54 = vpop.permute.xlu0 %637 }
 0x28f   : > { %4604 = vst [vmem:[#allocation134_spill] sm:$0xff] %v3484_v59  ;;  %4605 = vst [vmem:[#allocation135_spill] sm:$0xff] %v3486_v54 }
 0x290   : > { %1205 = vrot.lane.b32.xlu1 %v2954_v15, %s2567_s19  ;;  %1111 = vrot.lane.b32.xlu0 %v2948_v14, %s2570_s25 }
 0x292   : > { %v3492_v58 = vpop.permute.xlu1 %895  ;;  %v3494_v53 = vpop.permute.xlu0 %733 }
 0x293   : > { %4606 = vst [vmem:[#allocation136_spill] sm:$0xff] %v3494_v53 }
 0x294   : > { %921 = vrot.lane.b32.xlu1 %v2974_v21, %s2568_s20  ;;  %827 = vrot.lane.b32.xlu0 %v2968_v20, %s2566_s17 }
 0x296   : > { %v3500_v56 = vpop.permute.xlu1 %991  ;;  %v3502_v59 = vpop.permute.xlu0 %989 }
 0x298   : > { %923 = vrot.lane.b32.xlu1 %v2968_v20, %s2568_s20  ;;  %1207 = vrot.lane.b32.xlu0 %v2948_v14, %s2567_s19 }
 0x29a   : > { %v3508_v54 = vpop.permute.xlu1 %1087  ;;  %v3510_v15 = vpop.permute.xlu0 %1085 }
 0x29c   : > { %1019 = vrot.lane.b32.xlu1 %v2968_v20, %s2569_s24  ;;  %1017 = vrot.lane.b32.xlu0 %v2974_v21, %s2569_s24 }
 0x29e   : > { %v3516_v53 = vpop.permute.xlu1 %897  ;;  %v3518_v6 = vpop.permute.xlu0 %1181 }
 0x2a0   : > { %829 = vrot.lane.b32.xlu1 %v2994_v27, %s2566_s17  ;;  %1113 = vrot.lane.b32.xlu0 %v2974_v21, %s2570_s25 }
 0x2a2   : > { %v3524_v14 = vpop.permute.xlu1 %899  ;;  %v3526_v7 = vpop.permute.xlu0 %1183 }
 0x2a3   : > { %4607 = vst [vmem:[#allocation137_spill] sm:$0xff] %v3524_v14 }
 0x2a4   : > { %1209 = vrot.lane.b32.xlu1 %v2974_v21, %s2567_s19  ;;  %1115 = vrot.lane.b32.xlu0 %v2968_v20, %s2570_s25  ;;  %v1250_v21 = vsel %vm1249_vm2, %v2734_v39, %v2910_v3 }
 0x2a6   : > { %v3532_v62 = vpop.permute.xlu1 %995  ;;  %v3534_v63 = vpop.permute.xlu0 %993 }
 0x2a7   : > { %4608 = vst [vmem:[#allocation138_spill] sm:$0xff] %v3532_v62  ;;  %v1283_v62 = vsel %vm1282_vm3, %v1250_v21, %v2918_v5  ;;  %v1251_v21 = vsel %vm1249_vm2, %v2728_v38, %v2890_v61 }
 0x2a8   : > { %925 = vrot.lane.b32.xlu1 %v2994_v27, %s2568_s20  ;;  %831 = vrot.lane.b32.xlu0 %v2988_v26, %s2566_s17  ;;  %v1316_v3 = vsel %vm1315_vm4, %v1283_v62, %v2930_v9  ;;  %v1284_v38 = vsel %vm1282_vm3, %v1251_v21, %v2888_v60  ;;  %s4378_s17 = scalar_lea.hbm %s4432_s3, %s2255_s8 }
 0x2a9   : > { %v1349_v5 = vsel %vm1348_vm5, %v1316_v3, %v2936_v10 }
 0x2aa   : > { %v3540_v51 = vpop.permute.xlu1 %1091  ;;  %v3542_v46 = vpop.permute.xlu0 %1089 }
 0x2ab   : > { %4609 = vst [vmem:[#allocation139_spill] sm:$0xff] %v3540_v51 }
 0x2ac   : > { %927 = vrot.lane.b32.xlu1 %v2988_v26, %s2568_s20  ;;  %1211 = vrot.lane.b32.xlu0 %v2968_v20, %s2567_s19  ;;  %v1738_v20 = vld [vmem:[%s4431_s2 + $0x8] sm:$0xff]  ;;  %s2573_s20 = smov [#allocation2]  }
 0x2ad   : > { %v2446_v14 = vpack.c.bf16 %v1738_v20, %v1737_v55 }
 0x2ae   : > { %v3553_v57 = vpop.permute.xlu1 %901  ;;  %v3555_v51 = vpop.permute.xlu0 %1185 }
 0x2af   : > { %4610 = vst [vmem:[#allocation140_spill] sm:$0xff] %v3553_v57  ;;  %v1382_v57 = vsel %vm1381_vm6, %v1349_v5, %v2944_v12  ;;  %2447 = vmatprep.subr.bf16.mxu1 %v2446_v14  ;;  %v1252_v12 = vsel %vm1249_vm2, %v2742_v41, %v2998_v29  ;;  %v1253_v5 = vsel %vm1249_vm2, %v2736_v40, %v2938_v11 }
 0x2b0   : > { %1023 = vrot.lane.b32.xlu1 %v2988_v26, %s2569_s24  ;;  %1021 = vrot.lane.b32.xlu0 %v2994_v27, %s2569_s24  ;;  %v1415_v55 = vsel %vm1414_vm7, %v1382_v57, %v2956_v16  ;;  %v1317_v57 = vsel %vm1315_vm4, %v1284_v38, %v2900_v0  ;;  %v1285_v0 = vsel %vm1282_vm3, %v1252_v12, %v2986_v25  ;;  %v4612_v38 = vld [vmem:[#allocation34_spill] sm:$0xff]  ;;  %v4613_v12 = vld [vmem:[#allocation31_spill] sm:$0xff]  ;;  %s2504_s24 = sshll.u32 %s2573_s20, 4  ;;  %s2505_s24 = int_to_ptr.vmem [resolvable:$false] %s2504_s24 }
 0x2b1   : > { %2449 = vmatpush3.bf16.msra.mxu1 %v2446_v14  ;;  %v1448_v10 = vsel %vm1447_vm8, %v1415_v55, %v2964_v18  ;;  %v1350_v14 = vsel %vm1348_vm5, %v1317_v57, %v2908_v2  ;;  %p2507_p0 = scmp.lt.s32.totalorder %s4380_s9, %s2505_s24 }
 0x2b2   : > { %v3578_v62 = vpop.permute.xlu1 %903  ;;  %v3580_v9 = vpop.permute.xlu0 %1187  ;;  %v1383_v60 = vsel %vm1381_vm6, %v1350_v14, %v2916_v4  ;;  %v1318_v4 = vsel %vm1315_vm4, %v1285_v0, %v2996_v28  ;;  %v1286_v28 = vsel %vm1282_vm3, %v1253_v5, %v2946_v13  ;;  %v4616_v0 = vld [vmem:[#allocation41_spill] sm:$0xff] }
 0x2b3   : > { %v1416_v20 = vsel %vm1414_vm7, %v1383_v60, %v2928_v8  ;;  %v1351_v29 = vsel %vm1348_vm5, %v1318_v4, %v3006_v31  ;;  %v4615_v60 = vld [vmem:[#allocation32_spill] sm:$0xff]  ;;  %v4617_v4 = vld [vmem:[#allocation6_spill] sm:$0xff] }
 0x2b4   : > { %1512 = vrot.lane.b32.xlu1 %v1448_v10, %s2571_s30  ;;  %1117 = vrot.lane.b32.xlu0 %v2994_v27, %s2570_s25  ;;  %v1449_v8 = vsel %vm1447_vm8, %v1416_v20, %v2902_v1  ;;  %v1319_v1 = vsel %vm1315_vm4, %v1286_v28, %v2958_v17  ;;  %v1384_v31 = vsel %vm1381_vm6, %v1351_v29, %v3004_v30  ;;  %v4618_v29 = vld [vmem:[#allocation33_spill] sm:$0xff]  ;;  %v4619_v28 = vld [vmem:[#allocation43_spill] sm:$0xff] }
 0x2b5   : > { %v1352_v21 = vsel %vm1348_vm5, %v1319_v1, %v2966_v19  ;;  %v1417_v40 = vsel %vm1414_vm7, %v1384_v31, %v3012_v32  ;;  %v1254_v30 = vsel %vm1249_vm2, %v2750_v43, %v3038_v49  ;;  %v1255_v49 = vsel %vm1249_vm2, %v2744_v42, %v3014_v33  ;;  %v4614_v33 = vld [vmem:[#allocation35_spill] sm:$0xff]  ;;  %v4620_v31 = vld [vmem:[#allocation45_spill] sm:$0xff] }
 0x2b6   : > { %v3596_v16 = vpop.permute.xlu1 %999  ;;  %v3598_v18 = vpop.permute.xlu0 %997  ;;  %v1385_v55 = vsel %vm1381_vm6, %v1352_v21, %v2978_v23  ;;  %v1287_v32 = vsel %vm1282_vm3, %v1254_v30, %v3046_v47  ;;  %v4622_v30 = vld [vmem:[#allocation36_spill] sm:$0xff] }
 0x2b7   : > { %v1418_v19 = vsel %vm1414_vm7, %v1385_v55, %v2984_v24  ;;  %v1320_v23 = vsel %vm1315_vm4, %v1287_v32, %v3054_v44  ;;  %v1288_v24 = vsel %vm1282_vm3, %v1255_v49, %v3022_v35  ;;  %v4611_v44 = vld [vmem:[#allocation30_spill] sm:$0xff] }
 0x2b8   : > { %1119 = vrot.lane.b32.xlu1 %v2988_v26, %s2570_s25  ;;  %1608 = vrot.lane.b32.xlu0 %v2734_v39, %s2572_s4  ;;  %v1451_v47 = vsel %vm1447_vm8, %v1418_v19, %v2976_v22  ;;  %v4623_v19 = vld [vmem:[#allocation5_spill] sm:$0xff]  ;;  %s2506_s25 = scalar_lea.vmem %s2505_s24, 8192 }
 0x2b9   : > { %v1257_v32 = vsel %vm1249_vm2, %v4623_v19, %v4622_v30  ;;  %p2508_p1 = scmp.lt.s32.totalorder %s2506_s25, %s2500_s16 }
 0x2ba   : > { %v3610_v41 = vpop.permute.xlu1 %1095  ;;  %v3612_v2 = vpop.permute.xlu0 %1093 }
 0x2bb   : > { %p2509_p2 = por %p2508_p1, %p2507_p0 }
 0x2bc   : > { %1514 = vrot.lane.b32.xlu1 %v1449_v8, %s2571_s30  ;;  %1213 = vrot.lane.b32.xlu0 %v2994_v27, %s2567_s19  ;;  %v1256_v8 = vsel %vm1249_vm2, %v4617_v4, %v4616_v0  ;;  %v4632_v4 = vld [vmem:[#allocation55_spill] sm:$0xff] }
 0x2bd   : > { %v1289_v1 = vsel %vm1282_vm3, %v1256_v8, %v4619_v28  ;;  %v4633_v8 = vld [vmem:[#allocation8_spill] sm:$0xff]  ;;  %p2510_p3 = pnand %p2509_p2, %p2503_p13 }
 0x2be   : > { %v3623_v3 = vpop.permute.xlu1 %905  ;;  %v3625_v39 = vpop.permute.xlu0 %1189  ;;  %v1322_v21 = vsel %vm1315_vm4, %v1289_v1, %v4620_v31  ;;  %v4635_v1 = vld [vmem:[#allocation57_spill] sm:$0xff] }
 0x2c0   : > { %1215 = vrot.lane.b32.xlu1 %v2988_v26, %s2567_s19  ;;  %1610 = vrot.lane.b32.xlu0 %v2890_v61, %s2572_s4  ;;  %v1450_v61 = vsel %vm1447_vm8, %v1417_v40, %v3020_v34  ;;  %v1353_v34 = vsel %vm1348_vm5, %v1320_v23, %v3060_v45  ;;  %v4621_v40 = vld [vmem:[#allocation46_spill] sm:$0xff]  ;;  %v4624_v23 = vld [vmem:[#allocation29_spill] sm:$0xff]  ;;  %s4388_s19 = scalar_lea.sflag [#allocation3], %s164_s5 }
 0x2c1   : > { %v1386_v57 = vsel %vm1381_vm6, %v1353_v34, %v4612_v38  ;;  %v4628_v38 = vld [vmem:[#allocation40_spill] sm:$0xff] }
 0x2c2   : > { %v3644_v11 = vpop.permute.xlu1 %907  ;;  %v3646_v13 = vpop.permute.xlu0 %1191  ;;  %v1419_v22 = vsel %vm1414_vm7, %v1386_v57, %v4614_v33 }
 0x2c3   : > { %v1452_v20 = vsel %vm1447_vm8, %v1419_v22, %v3076_v48  ;;  %v1355_v48 = vsel %vm1348_vm5, %v1322_v21, %v4621_v40  ;;  %v4636_v21 = vld [vmem:[#allocation59_spill] sm:$0xff] }
 0x2c4   : > { %1612 = vrot.lane.b32.xlu1 %v2986_v25, %s2572_s4  ;;  %1516 = vrot.lane.b32.xlu0 %v1450_v61, %s2571_s30  ;;  %v1321_v25 = vsel %vm1315_vm4, %v1288_v24, %v4611_v44  ;;  %v4627_v44 = vld [vmem:[#allocation47_spill] sm:$0xff] }
 0x2c5   : > { %v1354_v42 = vsel %vm1348_vm5, %v1321_v25, %v4613_v12  ;;  %v1388_v25 = vsel %vm1381_vm6, %v1355_v48, %v4627_v44  ;;  %v4629_v12 = vld [vmem:[#allocation48_spill] sm:$0xff] }
 0x2c6   : > { %v3666_v10 = vpop.permute.xlu1 %1003  ;;  %v3668_v43 = vpop.permute.xlu0 %1001  ;;  %v4637_v48 = vld [vmem:[#allocation60_spill] sm:$0xff] }
 0x2c8   : > { %1614 = vrot.lane.b32.xlu1 %v2958_v17, %s2572_s4  ;;  %1518 = vrot.lane.b32.xlu0 %v1451_v47, %s2571_s30  ;;  %v1387_v17 = vsel %vm1381_vm6, %v1354_v42, %v4615_v60  ;;  %v4626_v47 = vld [vmem:[#allocation39_spill] sm:$0xff]  ;;  %v1421_v42 = vsel %vm1414_vm7, %v1388_v25, %v4629_v12  ;;  %v4642_v25 = vld [vmem:[#allocation53_spill] sm:$0xff] }
 0x2c9   : > { %v1420_v5 = vsel %vm1414_vm7, %v1387_v17, %v4618_v29  ;;  %v4630_v17 = vld [vmem:[#allocation42_spill] sm:$0xff]  ;;  %v1258_v29 = vsel %vm1249_vm2, %v4633_v8, %v4632_v4 }
 0x2ca   : > { %v3688_v14 = vpop.permute.xlu1 %1099  ;;  %v3690_v35 = vpop.permute.xlu0 %1097  ;;  %v1453_v34 = vsel %vm1447_vm8, %v1420_v5, %v4624_v23  ;;  %v4634_v5 = vld [vmem:[#allocation44_spill] sm:$0xff]  ;;  %v1291_v31 = vsel %vm1282_vm3, %v1258_v29, %v4635_v1  ;;  %v4638_v23 = vld [vmem:[#allocation49_spill] sm:$0xff] }
 0x2cb   : > { %v1324_v40 = vsel %vm1315_vm4, %v1291_v31, %v4636_v21  ;;  %v4646_v29 = vld [vmem:[#allocation56_spill] sm:$0xff]  ;;  %v4648_v31 = vld [vmem:[#allocation69_spill] sm:$0xff]  ;;  %v4649_v21 = vld [vmem:[#allocation10_spill] sm:$0xff] }
 0x2cc   : > { %1616 = vrot.lane.b32.xlu1 %v3060_v45, %s2572_s4  ;;  %1520 = vrot.lane.b32.xlu0 %v1452_v20, %s2571_s30  ;;  %v4625_v45 = vld [vmem:[#allocation37_spill] sm:$0xff]  ;;  %v4631_v20 = vld [vmem:[#allocation50_spill] sm:$0xff]  ;;  %v1357_v30 = vsel %vm1348_vm5, %v1324_v40, %v4637_v48  ;;  %v1260_v40 = vsel %vm1249_vm2, %v4649_v21, %v4648_v31  ;;  %v4660_v31 = vld [vmem:[#allocation68_spill] sm:$0xff] }
 0x2cd   : > { %v1290_v49 = vsel %vm1282_vm3, %v1257_v32, %v4625_v45  ;;  %v1454_v0 = vsel %vm1447_vm8, %v1421_v42, %v4631_v20  ;;  %v4644_v42 = vld [vmem:[#allocation54_spill] sm:$0xff] }
 0x2ce   : > { %v3710_v55 = vpop.permute.xlu1 %909  ;;  %v3712_v61 = vpop.permute.xlu0 %1193  ;;  %v1323_v24 = vsel %vm1315_vm4, %v1290_v49, %v4626_v47  ;;  %v4640_v49 = vld [vmem:[#allocation38_spill] sm:$0xff] }
 0x2cf   : > { %v1356_v57 = vsel %vm1348_vm5, %v1323_v24, %v4628_v38  ;;  %v4641_v24 = vld [vmem:[#allocation51_spill] sm:$0xff]  ;;  %v4650_v48 = vld [vmem:[#allocation58_spill] sm:$0xff] }
 0x2d0   : > { %1618 = vrot.lane.b32.xlu1 %v4615_v60, %s2572_s4  ;;  %1522 = vrot.lane.b32.xlu0 %v1453_v34, %s2571_s30  ;;  %v1389_v60 = vsel %vm1381_vm6, %v1356_v57, %v4630_v17  ;;  %v4639_v34 = vld [vmem:[#allocation7_spill] sm:$0xff]  ;;  %v4643_v57 = vld [vmem:[#allocation61_spill] sm:$0xff] }
 0x2d1   : > { %v1422_v28 = vsel %vm1414_vm7, %v1389_v60, %v4634_v5  ;;  %v1259_v45 = vsel %vm1249_vm2, %v4639_v34, %v4638_v23  ;;  %v4645_v60 = vld [vmem:[#allocation62_spill] sm:$0xff]  ;;  %v4651_v34 = vld [vmem:[#allocation71_spill] sm:$0xff] }
 0x2d2   : > { %v3732_v33 = vpop.permute.xlu1 %911  ;;  %v3734_v22 = vpop.permute.xlu0 %1195  ;;  %v1455_v47 = vsel %vm1447_vm8, %v1422_v28, %v4640_v49  ;;  %v1292_v44 = vsel %vm1282_vm3, %v1259_v45, %v4641_v24  ;;  %v4647_v28 = vld [vmem:[#allocation64_spill] sm:$0xff]  ;;  %v1293_v45 = vsel %vm1282_vm3, %v1260_v40, %v4651_v34  ;;  %v4653_v24 = vld [vmem:[#allocation74_spill] sm:$0xff] }
 0x2d3   : > { %v1325_v38 = vsel %vm1315_vm4, %v1292_v44, %v4642_v25  ;;  %v4661_v40 = vld [vmem:[#allocation76_spill] sm:$0xff] }
 0x2d4   : > { %1620 = vrot.lane.b32.xlu1 %v4629_v12, %s2572_s4  ;;  %1524 = vrot.lane.b32.xlu0 %v1454_v0, %s2571_s30  ;;  %v1390_v12 = vsel %vm1381_vm6, %v1357_v30, %v4643_v57  ;;  %v1358_v17 = vsel %vm1348_vm5, %v1325_v38, %v4644_v42  ;;  %v4654_v57 = vld [vmem:[#allocation63_spill] sm:$0xff] }
 0x2d5   : > { %v1423_v20 = vsel %vm1414_vm7, %v1390_v12, %v4645_v60  ;;  %v1391_v5 = vsel %vm1381_vm6, %v1358_v17, %v4646_v29  ;;  %v4655_v12 = vld [vmem:[#allocation9_spill] sm:$0xff]  ;;  %v4656_v17 = vld [vmem:[#allocation52_spill] sm:$0xff]  ;;  %v4658_v29 = vld [vmem:[#allocation67_spill] sm:$0xff] }
 0x2d6   : > { %v3754_v19 = vpop.permute.xlu1 %1007  ;;  %v3756_v32 = vpop.permute.xlu0 %1005  ;;  %v1456_v1 = vsel %vm1447_vm8, %v1423_v20, %v4647_v28  ;;  %v1424_v30 = vsel %vm1414_vm7, %v1391_v5, %v4650_v48  ;;  %v1261_v42 = vsel %vm1249_vm2, %v4655_v12, %v4654_v57  ;;  %v4659_v28 = vld [vmem:[#allocation75_spill] sm:$0xff]  ;;  %v4665_v12 = vld [vmem:[#allocation12_spill] sm:$0xff] }
 0x2d7   : > { %v1457_v60 = vsel %vm1447_vm8, %v1424_v30, %v4656_v17  ;;  %v4664_v57 = vld [vmem:[#allocation83_spill] sm:$0xff] }
 0x2d8   : > { %1622 = vrot.lane.b32.xlu1 %v4640_v49, %s2572_s4  ;;  %1526 = vrot.lane.b32.xlu0 %v1455_v47, %s2571_s30  ;;  %v4652_v49 = vld [vmem:[#allocation73_spill] sm:$0xff] }
 0x2d9   : > { %v1326_v47 = vsel %vm1315_vm4, %v1293_v45, %v4652_v49  ;;  %v4662_v49 = vld [vmem:[#allocation70_spill] sm:$0xff] }
 0x2da   : > { %v3776_v0 = vpop.permute.xlu1 %1103  ;;  %v3778_v4 = vpop.permute.xlu0 %1101  ;;  %v1359_v44 = vsel %vm1348_vm5, %v1326_v47, %v4653_v24  ;;  %v4663_v47 = vld [vmem:[#allocation78_spill] sm:$0xff] }
 0x2dc   : > { %1624 = vrot.lane.b32.xlu1 %v4633_v8, %s2572_s4  ;;  %1528 = vrot.lane.b32.xlu0 %v1456_v1, %s2571_s30  ;;  %v4657_v8 = vld [vmem:[#allocation65_spill] sm:$0xff]  ;;  %v1392_v1 = vsel %vm1381_vm6, %v1359_v44, %v4659_v28  ;;  %v1262_v44 = vsel %vm1249_vm2, %v4665_v12, %v4664_v57  ;;  %v4669_v28 = vld [vmem:[#allocation88_spill] sm:$0xff] }
 0x2dd   : > { %v1294_v20 = vsel %vm1282_vm3, %v1261_v42, %v4657_v8  ;;  %v1425_v48 = vsel %vm1414_vm7, %v1392_v1, %v4661_v40  ;;  %v4666_v42 = vld [vmem:[#allocation72_spill] sm:$0xff]  ;;  %v4670_v40 = vld [vmem:[#allocation77_spill] sm:$0xff] }
 0x2de   : > { %v3798_v25 = vpop.permute.xlu1 %913  ;;  %v3800_v38 = vpop.permute.xlu0 %1197  ;;  %v1327_v5 = vsel %vm1315_vm4, %v1294_v20, %v4658_v29  ;;  %v1458_v24 = vsel %vm1447_vm8, %v1425_v48, %v4663_v47  ;;  %v4668_v20 = vld [vmem:[#allocation87_spill] sm:$0xff]  ;;  %v4674_v57 = vld [vmem:[#allocation81_spill] sm:$0xff] }
 0x2df   : > { %v1360_v21 = vsel %vm1348_vm5, %v1327_v5, %v4660_v31  ;;  %v4671_v48 = vld [vmem:[#allocation11_spill] sm:$0xff] }
 0x2e0   : > { %1626 = vrot.lane.b32.xlu1 %v4638_v23, %s2572_s4  ;;  %1530 = vrot.lane.b32.xlu0 %v1457_v60, %s2571_s30  ;;  %v1393_v23 = vsel %vm1381_vm6, %v1360_v21, %v4662_v49  ;;  %v4667_v60 = vld [vmem:[#allocation85_spill] sm:$0xff]  ;;  %v1263_v49 = vsel %vm1249_vm2, %v4671_v48, %v4670_v40  ;;  %v4677_v40 = vld [vmem:[#allocation84_spill] sm:$0xff] }
 0x2e1   : > { %v1426_v17 = vsel %vm1414_vm7, %v1393_v23, %v4666_v42  ;;  %v1295_v8 = vsel %vm1282_vm3, %v1262_v44, %v4667_v60  ;;  %v4672_v23 = vld [vmem:[#allocation66_spill] sm:$0xff] }
 0x2e2   : > { %v3820_v30 = vpop.permute.xlu1 %915  ;;  %v3822_v45 = vpop.permute.xlu0 %1199  ;;  %v1328_v5 = vsel %vm1315_vm4, %v1295_v8, %v4668_v20  ;;  %v1459_v47 = vsel %vm1447_vm8, %v1426_v17, %v4672_v23  ;;  %v4675_v42 = vld [vmem:[#allocation82_spill] sm:$0xff]  ;;  %v4676_v8 = vld [vmem:[#allocation89_spill] sm:$0xff] }
 0x2e3   : > { %v1361_v1 = vsel %vm1348_vm5, %v1328_v5, %v4669_v28  ;;  %v4679_v23 = vld [vmem:[#allocation14_spill] sm:$0xff] }
 0x2e4   : > { %1628 = vrot.lane.b32.xlu1 %v4651_v34, %s2572_s4  ;;  %1532 = vrot.lane.b32.xlu0 %v1458_v24, %s2571_s30  ;;  %v4673_v34 = vld [vmem:[#allocation79_spill] sm:$0xff]  ;;  %v1394_v44 = vsel %vm1381_vm6, %v1361_v1, %v3286_v50  ;;  %v4680_v1 = vld [vmem:[#allocation86_spill] sm:$0xff] }
 0x2e5   : > { %v1296_v24 = vsel %vm1282_vm3, %v1263_v49, %v4673_v34  ;;  %v1427_v17 = vsel %vm1414_vm7, %v1394_v44, %v4676_v8  ;;  %v4678_v49 = vld [vmem:[#allocation93_spill] sm:$0xff]  ;;  %v4682_v44 = vld [vmem:[#allocation80_spill] sm:$0xff] }
 0x2e6   : > { %v3842_v31 = vpop.permute.xlu1 %1011  ;;  %v3844_v21 = vpop.permute.xlu0 %1009  ;;  %v1329_v12 = vsel %vm1315_vm4, %v1296_v24, %v4674_v57  ;;  %v1460_v48 = vsel %vm1447_vm8, %v1427_v17, %v3300_v37  ;;  %v1264_v50 = vsel %vm1249_vm2, %v4679_v23, %v4678_v49  ;;  %v4681_v24 = vld [vmem:[#allocation95_spill] sm:$0xff] }
 0x2e7   : > { %v1362_v60 = vsel %vm1348_vm5, %v1329_v12, %v4675_v42  ;;  %v1297_v34 = vsel %vm1282_vm3, %v1264_v50, %v3318_v36  ;;  %v4684_v36 = vld [vmem:[#allocation90_spill] sm:$0xff] }
 0x2e8   : > { %1630 = vrot.lane.b32.xlu1 %v4658_v29, %s2572_s4  ;;  %1534 = vrot.lane.b32.xlu0 %v1459_v47, %s2571_s30  ;;  %v1395_v29 = vsel %vm1381_vm6, %v1362_v60, %v4677_v40  ;;  %v1330_v57 = vsel %vm1315_vm4, %v1297_v34, %v4681_v24  ;;  %v4683_v60 = vld [vmem:[#allocation94_spill] sm:$0xff] }
 0x2e9   : > { %v1428_v47 = vsel %vm1414_vm7, %v1395_v29, %v4680_v1  ;;  %v1363_v8 = vsel %vm1348_vm5, %v1330_v57, %v4683_v60 }
 0x2ea   : > { %v3864_v20 = vpop.permute.xlu1 %821  ;;  %v3866_v5 = vpop.permute.xlu0 %1105  ;;  %v1461_v42 = vsel %vm1447_vm8, %v1428_v47, %v4682_v44  ;;  %v1396_v29 = vsel %vm1381_vm6, %v1363_v8, %v3502_v59  ;;  %v4688_v59 = vld [vmem:[#allocation16_spill] sm:$0xff] }
 0x2eb   : > { %v1429_v23 = vsel %vm1414_vm7, %v1396_v29, %v3510_v15  ;;  %v1266_v57 = vsel %vm1249_vm2, %v4688_v59, %v3334_v52 }
 0x2ec   : > { %1632 = vrot.lane.b32.xlu1 %v4669_v28, %s2572_s4  ;;  %1536 = vrot.lane.b32.xlu0 %v1460_v48, %s2571_s30  ;;  %v4685_v28 = vld [vmem:[#allocation13_spill] sm:$0xff]  ;;  %v4686_v48 = vld [vmem:[#allocation91_spill] sm:$0xff]  ;;  %v1462_v34 = vsel %vm1447_vm8, %v1429_v23, %v3518_v6 }
 0x2ed   : > { %v1265_v17 = vsel %vm1249_vm2, %v4685_v28, %v4684_v36 }
 0x2ee   : > { %v3884_v12 = vpop.permute.xlu1 %1201  ;;  %v3886_v37 = vpop.permute.xlu0 %1107  ;;  %v1298_v49 = vsel %vm1282_vm3, %v1265_v17, %v4686_v48  ;;  %v4693_v48 = vld [vmem:[#allocation97_spill] sm:$0xff] }
 0x2f0   : > { %1634 = vrot.lane.b32.xlu1 %v4677_v40, %s2572_s4  ;;  %1538 = vrot.lane.b32.xlu0 %v1461_v42, %s2571_s30  ;;  %v4687_v40 = vld [vmem:[#allocation92_spill] sm:$0xff]  ;;  %v4689_v42 = vld [vmem:[#allocation99_spill] sm:$0xff] }
 0x2f1   : > { %v1331_v47 = vsel %vm1315_vm4, %v1298_v49, %v4687_v40  ;;  %v1299_v60 = vsel %vm1282_vm3, %v1266_v57, %v4689_v42  ;;  %v4698_v42 = vld [vmem:[#allocation138_spill] sm:$0xff] }
 0x2f2   : > { %v3904_v50 = vpop.permute.xlu1 %917  ;;  %v3906_v1 = vpop.permute.xlu0 %823  ;;  %v1364_v24 = vsel %vm1348_vm5, %v1331_v47, %v3492_v58 }
 0x2f3   : > { %v1397_v44 = vsel %vm1381_vm6, %v1364_v24, %v3500_v56  ;;  %v4691_v56 = vld [vmem:[#allocation96_spill] sm:$0xff]  ;;  %v4695_v24 = vld [vmem:[#allocation137_spill] sm:$0xff] }
 0x2f4   : > { %1636 = vrot.lane.b32.xlu1 %v3510_v15, %s2572_s4  ;;  %1540 = vrot.lane.b32.xlu0 %v1462_v34, %s2571_s30  ;;  %v1430_v6 = vsel %vm1414_vm7, %v1397_v44, %v3508_v54  ;;  %v4690_v15 = vld [vmem:[#allocation100_spill] sm:$0xff]  ;;  %v4692_v54 = vld [vmem:[#allocation15_spill] sm:$0xff] }
 0x2f5   : > { %v1332_v36 = vsel %vm1315_vm4, %v1299_v60, %v4690_v15  ;;  %v1463_v28 = vsel %vm1447_vm8, %v1430_v6, %v3526_v7  ;;  %v1267_v17 = vsel %vm1249_vm2, %v4692_v54, %v4691_v56  ;;  %v4699_v6 = vld [vmem:[#allocation105_spill] sm:$0xff] }
 0x2f6   : > { %v3926_v8 = vpop.permute.xlu1 %919  ;;  %v3928_v58 = vpop.permute.xlu0 %1203  ;;  %v1365_v52 = vsel %vm1348_vm5, %v1332_v36, %v3516_v53  ;;  %v1300_v49 = vsel %vm1282_vm3, %v1267_v17, %v4693_v48  ;;  %v4700_v36 = vld [vmem:[#allocation139_spill] sm:$0xff] }
 0x2f7   : > { %v1398_v29 = vsel %vm1381_vm6, %v1365_v52, %v3534_v63  ;;  %v4696_v63 = vld [vmem:[#allocation103_spill] sm:$0xff] }
 0x2f8   : > { %1638 = vrot.lane.b32.xlu1 %v3526_v7, %s2572_s4  ;;  %1542 = vrot.lane.b32.xlu0 %v1463_v28, %s2571_s30  ;;  %v1431_v23 = vsel %vm1414_vm7, %v1398_v29, %v3542_v46  ;;  %v4694_v7 = vld [vmem:[#allocation98_spill] sm:$0xff]  ;;  %v4702_v29 = vld [vmem:[#allocation140_spill] sm:$0xff] }
 0x2f9   : > { %v1333_v47 = vsel %vm1315_vm4, %v1300_v49, %v4694_v7  ;;  %v1464_v34 = vsel %vm1447_vm8, %v1431_v23, %v3555_v51  ;;  %v4697_v46 = vld [vmem:[#allocation18_spill] sm:$0xff]  ;;  %v4703_v49 = vld [vmem:[#allocation101_spill] sm:$0xff] }
 0x2fa   : > { %v3948_v40 = vpop.permute.xlu1 %1015  ;;  %v3950_v53 = vpop.permute.xlu0 %1013  ;;  %v1366_v57 = vsel %vm1348_vm5, %v1333_v47, %v4695_v24  ;;  %v1268_v44 = vsel %vm1249_vm2, %v4697_v46, %v4696_v63  ;;  %v4704_v23 = vld [vmem:[#allocation17_spill] sm:$0xff] }
 0x2fb   : > { %v1399_v60 = vsel %vm1381_vm6, %v1366_v57, %v4698_v42  ;;  %v1301_v15 = vsel %vm1282_vm3, %v1268_v44, %v4699_v6  ;;  %v1269_v7 = vsel %vm1249_vm2, %v4704_v23, %v4703_v49  ;;  %v4713_v23 = vld [vmem:[#allocation108_spill] sm:$0xff] }
 0x2fc   : > { %1640 = vrot.lane.b32.xlu1 %v4688_v59, %s2572_s4  ;;  %1544 = vrot.lane.b32.xlu0 %v1464_v34, %s2571_s30  ;;  %v1432_v51 = vsel %vm1414_vm7, %v1399_v60, %v4700_v36  ;;  %v4701_v59 = vld [vmem:[#allocation106_spill] sm:$0xff]  ;;  %v4709_v36 = vld [vmem:[#allocation111_spill] sm:$0xff] }
 0x2fd   : > { %v1334_v54 = vsel %vm1315_vm4, %v1301_v15, %v4701_v59  ;;  %v1465_v17 = vsel %vm1447_vm8, %v1432_v51, %v3580_v9  ;;  %v4705_v34 = vld [vmem:[#allocation102_spill] sm:$0xff] }
 0x2fe   : > { %v3970_v28 = vpop.permute.xlu1 %825  ;;  %v3972_v52 = vpop.permute.xlu0 %1109  ;;  %v1367_v48 = vsel %vm1348_vm5, %v1334_v54, %v4702_v29  ;;  %v1302_v24 = vsel %vm1282_vm3, %v1269_v7, %v4705_v34 }
 0x2ff   : > { %v1400_v47 = vsel %vm1381_vm6, %v1367_v48, %v3598_v18  ;;  %v4707_v18 = vld [vmem:[#allocation109_spill] sm:$0xff] }
 0x300   : > { %1642 = vrot.lane.b32.xlu1 %v4691_v56, %s2572_s4  ;;  %1546 = vrot.lane.b32.xlu0 %v1465_v17, %s2571_s30  ;;  %v1433_v9 = vsel %vm1414_vm7, %v1400_v47, %v3612_v2  ;;  %v4706_v56 = vld [vmem:[#allocation104_spill] sm:$0xff] }
 0x301   : > { %v1335_v46 = vsel %vm1315_vm4, %v1302_v24, %v4706_v56  ;;  %v1466_v44 = vsel %vm1447_vm8, %v1433_v9, %v3625_v39  ;;  %v4708_v2 = vld [vmem:[#allocation20_spill] sm:$0xff]  ;;  %v4714_v24 = vld [vmem:[#allocation110_spill] sm:$0xff] }
 0x302   : > { %v3992_v57 = vpop.permute.xlu1 %1205  ;;  %v3994_v63 = vpop.permute.xlu0 %1111  ;;  %v1368_v42 = vsel %vm1348_vm5, %v1335_v46, %v3578_v62  ;;  %v1270_v60 = vsel %vm1249_vm2, %v4708_v2, %v4707_v18  ;;  %v4717_v18 = vld [vmem:[#allocation117_spill] sm:$0xff] }
 0x303   : > { %v1401_v15 = vsel %vm1381_vm6, %v1368_v42, %v3596_v16  ;;  %v1303_v51 = vsel %vm1282_vm3, %v1270_v60, %v4709_v36  ;;  %v4711_v16 = vld [vmem:[#allocation107_spill] sm:$0xff] }
 0x304   : > { %1644 = vrot.lane.b32.xlu1 %v4699_v6, %s2572_s4  ;;  %1548 = vrot.lane.b32.xlu0 %v1466_v44, %s2571_s30  ;;  %v1434_v39 = vsel %vm1414_vm7, %v1401_v15, %v3610_v41  ;;  %v4710_v6 = vld [vmem:[#allocation112_spill] sm:$0xff]  ;;  %v4712_v41 = vld [vmem:[#allocation19_spill] sm:$0xff] }
 0x305   : > { %v1336_v54 = vsel %vm1315_vm4, %v1303_v51, %v4710_v6  ;;  %v1467_v17 = vsel %vm1447_vm8, %v1434_v39, %v3646_v13  ;;  %v1271_v48 = vsel %vm1249_vm2, %v4712_v41, %v4711_v16  ;;  %v4719_v39 = vld [vmem:[#allocation113_spill] sm:$0xff] }
 0x306   : > { %v4014_v59 = vpop.permute.xlu1 %921  ;;  %v4016_v62 = vpop.permute.xlu0 %827  ;;  %v1369_v29 = vsel %vm1348_vm5, %v1336_v54, %v3623_v3  ;;  %v1304_v7 = vsel %vm1282_vm3, %v1271_v48, %v4713_v23  ;;  %v4724_v23 = vld [vmem:[#allocation24_spill] sm:$0xff] }
 0x307   : > { %v1402_v49 = vsel %vm1381_vm6, %v1369_v29, %v3668_v43  ;;  %v1337_v9 = vsel %vm1315_vm4, %v1304_v7, %v4714_v24  ;;  %v4715_v43 = vld [vmem:[#allocation115_spill] sm:$0xff] }
 0x308   : > { %1646 = vrot.lane.b32.xlu1 %v4706_v56, %s2572_s4  ;;  %1550 = vrot.lane.b32.xlu0 %v1467_v17, %s2571_s30  ;;  %v1435_v13 = vsel %vm1414_vm7, %v1402_v49, %v3690_v35  ;;  %v1370_v46 = vsel %vm1348_vm5, %v1337_v9, %v3644_v11  ;;  %v4716_v35 = vld [vmem:[#allocation22_spill] sm:$0xff]  ;;  %v4725_v24 = vld [vmem:[#allocation123_spill] sm:$0xff] }
 0x309   : > { %v1468_v56 = vsel %vm1447_vm8, %v1435_v13, %v3712_v61  ;;  %v1272_v44 = vsel %vm1249_vm2, %v4716_v35, %v4715_v43  ;;  %v1403_v42 = vsel %vm1381_vm6, %v1370_v46, %v3666_v10  ;;  %v4721_v17 = vld [vmem:[#allocation114_spill] sm:$0xff]  ;;  %v4726_v46 = vld [vmem:[#allocation124_spill] sm:$0xff] }
 0x30a   : > { %v4036_v47 = vpop.permute.xlu1 %923  ;;  %v4038_v34 = vpop.permute.xlu0 %1207  ;;  %v1305_v2 = vsel %vm1282_vm3, %v1272_v44, %v4717_v18  ;;  %v1436_v61 = vsel %vm1414_vm7, %v1403_v42, %v3688_v14  ;;  %v4720_v14 = vld [vmem:[#allocation21_spill] sm:$0xff]  ;;  %v4728_v44 = vld [vmem:[#allocation23_spill] sm:$0xff]  ;;  %v4729_v18 = vld [vmem:[#allocation120_spill] sm:$0xff] }
 0x30b   : > { %v1469_v36 = vsel %vm1447_vm8, %v1436_v61, %v3734_v22  ;;  %v1273_v6 = vsel %vm1249_vm2, %v4720_v14, %v4719_v39 }
 0x30c   : > { %1648 = vrot.lane.b32.xlu1 %v3623_v3, %s2572_s4  ;;  %1552 = vrot.lane.b32.xlu0 %v1468_v56, %s2571_s30  ;;  %v4718_v3 = vld [vmem:[#allocation118_spill] sm:$0xff]  ;;  %v1306_v29 = vsel %vm1282_vm3, %v1273_v6, %v4721_v17  ;;  %v4733_v6 = vld [vmem:[#allocation128_spill] sm:$0xff] }
 0x30d   : > { %v1338_v15 = vsel %vm1315_vm4, %v1305_v2, %v4718_v3 }
 0x30e   : > { %v4058_v60 = vpop.permute.xlu1 %1019  ;;  %v4060_v11 = vpop.permute.xlu0 %1017  ;;  %v1371_v51 = vsel %vm1348_vm5, %v1338_v15, %v3710_v55  ;;  %v4730_v15 = vld [vmem:[#allocation122_spill] sm:$0xff] }
 0x30f   : > { %v1404_v54 = vsel %vm1381_vm6, %v1371_v51, %v3756_v32  ;;  %v4723_v32 = vld [vmem:[#allocation121_spill] sm:$0xff] }
 0x310   : > { %1650 = vrot.lane.b32.xlu1 %v3666_v10, %s2572_s4  ;;  %1554 = vrot.lane.b32.xlu0 %v1469_v36, %s2571_s30  ;;  %v1437_v22 = vsel %vm1414_vm7, %v1404_v54, %v3778_v4  ;;  %v4722_v10 = vld [vmem:[#allocation116_spill] sm:$0xff]  ;;  %v1274_v7 = vsel %vm1249_vm2, %v4724_v23, %v4723_v32 }
 0x311   : > { %v1339_v41 = vsel %vm1315_vm4, %v1306_v29, %v4722_v10  ;;  %v1470_v48 = vsel %vm1447_vm8, %v1437_v22, %v3800_v38  ;;  %v1307_v9 = vsel %vm1282_vm3, %v1274_v7, %v4725_v24  ;;  %v4738_v24 = vld [vmem:[#allocation28_spill] sm:$0xff] }
 0x312   : > { %v4080_v16 = vpop.permute.xlu1 %829  ;;  %v4082_v55 = vpop.permute.xlu0 %1113  ;;  %v1372_v49 = vsel %vm1348_vm5, %v1339_v41, %v3732_v33  ;;  %v4735_v41 = vld [vmem:[#allocation25_spill] sm:$0xff] }
 0x313   : > { %v1405_v13 = vsel %vm1381_vm6, %v1372_v49, %v3754_v19  ;;  %v4727_v19 = vld [vmem:[#allocation119_spill] sm:$0xff]  ;;  %v4736_v49 = vld [vmem:[#allocation126_spill] sm:$0xff] }
 0x314   : > { %1652 = vrot.lane.b32.xlu1 %v3778_v4, %s2572_s4  ;;  %1556 = vrot.lane.b32.xlu0 %v1470_v48, %s2571_s30  ;;  %v1438_v38 = vsel %vm1414_vm7, %v1405_v13, %v3776_v0  ;;  %v1340_v4 = vsel %vm1315_vm4, %v1307_v9, %v4726_v46  ;;  %v1275_v0 = vsel %vm1249_vm2, %v4728_v44, %v4727_v19  ;;  %v4741_v44 = vld [vmem:[#allocation27_spill] sm:$0xff] }
 0x315   : > { %v1471_v43 = vsel %vm1447_vm8, %v1438_v38, %v3822_v45  ;;  %v1373_v35 = vsel %vm1348_vm5, %v1340_v4, %v3798_v25  ;;  %v1308_v2 = vsel %vm1282_vm3, %v1275_v0, %v4729_v18  ;;  %v4739_v38 = vld [vmem:[#allocation132_spill] sm:$0xff] }
 0x316   : > { %v1210_v56 = vpop.permute.xlu1 %1209  ;;  %v4102_v33 = vpop.permute.xlu0 %1115  ;;  %v1406_v42 = vsel %vm1381_vm6, %v1373_v35, %v3844_v21  ;;  %v4731_v21 = vld [vmem:[#allocation127_spill] sm:$0xff] }
 0x317   : > { %v1439_v61 = vsel %vm1414_vm7, %v1406_v42, %v3866_v5  ;;  %v4732_v5 = vld [vmem:[#allocation26_spill] sm:$0xff] }
 0x318   : > { %1558 = vrot.lane.b32.xlu0 %v1471_v43, %s2571_s30  ;;  %1654 = vrot.lane.b32.xlu1 %v3822_v45, %s2572_s4  ;;  %v1341_v45 = vsel %vm1315_vm4, %v1308_v2, %v4730_v15  ;;  %v1472_v36 = vsel %vm1447_vm8, %v1439_v61, %v3884_v12  ;;  %v1276_v39 = vsel %vm1249_vm2, %v4732_v5, %v4731_v21 }
 0x319   : > { %v1374_v51 = vsel %vm1348_vm5, %v1341_v45, %v3820_v30  ;;  %v1309_v54 = vsel %vm1282_vm3, %v1276_v39, %v4733_v6  ;;  %v4745_v39 = vld [vmem:[#allocation133_spill] sm:$0xff] }
 0x31a   : > { %v4122_v3 = vpop.permute.xlu1 %925  ;;  %v4124_v25 = vpop.permute.xlu0 %831  ;;  %v1407_v14 = vsel %vm1381_vm6, %v1374_v51, %v3842_v31  ;;  %v1342_v29 = vsel %vm1315_vm4, %v1309_v54, %v3864_v20  ;;  %v4734_v31 = vld [vmem:[#allocation125_spill] sm:$0xff] }
 0x31b   : > { %v1440_v12 = vsel %vm1414_vm7, %v1407_v14, %v3886_v37  ;;  %v1375_v10 = vsel %vm1348_vm5, %v1342_v29, %v3904_v50  ;;  %v1277_v37 = vsel %vm1249_vm2, %v4735_v41, %v4734_v31  ;;  %v1281_v14 = vsel %vm1249_vm2, %v2988_v26, %v4745_v39 }
 0x31c   : > { %1656 = vrot.lane.b32.xlu1 %v4724_v23, %s2572_s4  ;;  %1560 = vrot.lane.b32.xlu0 %v1472_v36, %s2571_s30  ;;  %v1473_v22 = vsel %vm1447_vm8, %v1440_v12, %v3928_v58  ;;  %v1408_v48 = vsel %vm1381_vm6, %v1375_v10, %v3950_v53  ;;  %v1310_v20 = vsel %vm1282_vm3, %v1277_v37, %v4736_v49  ;;  %v4737_v53 = vld [vmem:[#allocation131_spill] sm:$0xff] }
 0x31d   : > { %v1441_v58 = vsel %vm1414_vm7, %v1408_v48, %v3972_v52  ;;  %v1343_v23 = vsel %vm1315_vm4, %v1310_v20, %v3906_v1  ;;  %v1278_v52 = vsel %vm1249_vm2, %v4738_v24, %v4737_v53 }
 0x31e   : > { %v4144_v17 = vpop.permute.xlu1 %927  ;;  %v1212_v30 = vpop.permute.xlu0 %1211  ;;  %v1474_v7 = vsel %vm1447_vm8, %v1441_v58, %v3992_v57  ;;  %v1376_v13 = vsel %vm1348_vm5, %v1343_v23, %v3926_v8  ;;  %v1311_v46 = vsel %vm1282_vm3, %v1278_v52, %v4739_v38 }
 0x31f   : > { %v1409_v9 = vsel %vm1381_vm6, %v1376_v13, %v3948_v40  ;;  %v1344_v43 = vsel %vm1315_vm4, %v1311_v46, %v3970_v28  ;;  %v4740_v40 = vld [vmem:[#allocation129_spill] sm:$0xff]  ;;  %v4742_v28 = vld [vmem:[#allocation130_spill] sm:$0xff] }
 0x320   : > { %1658 = vrot.lane.b32.xlu1 %v4727_v19, %s2572_s4  ;;  %1562 = vrot.lane.b32.xlu0 %v1473_v22, %s2571_s30  ;;  %v1442_v57 = vsel %vm1414_vm7, %v1409_v9, %v3994_v63  ;;  %v1377_v19 = vsel %vm1348_vm5, %v1344_v43, %v4014_v59  ;;  %v1279_v63 = vsel %vm1249_vm2, %v4741_v44, %v4740_v40 }
 0x321   : > { %v1475_v35 = vsel %vm1447_vm8, %v1442_v57, %v4038_v34  ;;  %v1410_v0 = vsel %vm1381_vm6, %v1377_v19, %v4060_v11  ;;  %v1312_v42 = vsel %vm1282_vm3, %v1279_v63, %v4742_v28  ;;  %v4743_v11 = vld [vmem:[#allocation135_spill] sm:$0xff] }
 0x322   : > { %v1024_v32 = vpop.permute.xlu1 %1023  ;;  %v1022_v50 = vpop.permute.xlu0 %1021  ;;  %v1443_v34 = vsel %vm1414_vm7, %v1410_v0, %v4082_v55  ;;  %v1280_v55 = vsel %vm1249_vm2, %v2994_v27, %v4743_v11 }
 0x323   : > { %v1476_v61 = vsel %vm1447_vm8, %v1443_v34, %v1210_v56 }
 0x324   : > { %1660 = vrot.lane.b32.xlu1 %v4733_v6, %s2572_s4  ;;  %1564 = vrot.lane.b32.xlu0 %v1474_v7, %s2571_s30  ;;  %v4746_v6 = vld [vmem:[#allocation134_spill] sm:$0xff] }
 0x325   : > { %v1314_v54 = vsel %vm1282_vm3, %v1281_v14, %v4746_v6 }
 0x326   : > { %v1513_v4 = vpop.permute.xlu1 %1512  ;;  %v1118_v8 = vpop.permute.xlu0 %1117 }
 0x328   : > { %1662 = vrot.lane.b32.xlu1 %v3906_v1, %s2572_s4  ;;  %1566 = vrot.lane.b32.xlu0 %v1475_v35, %s2571_s30  ;;  %v1345_v1 = vsel %vm1315_vm4, %v1312_v42, %v4016_v62  ;;  %v4744_v62 = vld [vmem:[#allocation136_spill] sm:$0xff] }
 0x329   : > { %v1378_v45 = vsel %vm1348_vm5, %v1345_v1, %v4036_v47  ;;  %v1313_v56 = vsel %vm1282_vm3, %v1280_v55, %v4744_v62 }
 0x32a   : > { %v1120_v18 = vpop.permute.xlu1 %1119  ;;  %v1609_v2 = vpop.permute.xlu0 %1608  ;;  %v1411_v36 = vsel %vm1381_vm6, %v1378_v45, %v4058_v60 }
 0x32b   : > { %v1705_v15 = vsel %vm1704_vm9, %v1513_v4, %v1609_v2  ;;  %v1444_v47 = vsel %vm1414_vm7, %v1411_v36, %v4102_v33 }
 0x32c   : > { %1664 = vrot.lane.b32.xlu1 %v4014_v59, %s2572_s4  ;;  %1568 = vrot.lane.b32.xlu0 %v1476_v61, %s2571_s30  ;;  %v1346_v59 = vsel %vm1315_vm4, %v1313_v56, %v4080_v16  ;;  %v1477_v5 = vsel %vm1447_vm8, %v1444_v47, %v1212_v30 }
 0x32d   : > { %2386 = vmatprep.mubr.msk.f32.mxu1 %vm1739_vm10, %v1705_v15  ;;  %v1379_v27 = vsel %vm1348_vm5, %v1346_v59, %v4122_v3  ;;  %v1347_v3 = vsel %vm1315_vm4, %v1314_v54, %v4124_v25 }
 0x32e   : > { %v1515_v51 = vpop.permute.xlu1 %1514  ;;  %v1214_v21 = vpop.permute.xlu0 %1213  ;;  %v1412_v33 = vsel %vm1381_vm6, %v1379_v27, %v1022_v50  ;;  %v1380_v22 = vsel %vm1348_vm5, %v1347_v3, %v4144_v17 }
 0x32f   : > { %v1445_v16 = vsel %vm1414_vm7, %v1412_v33, %v1118_v8  ;;  %v1413_v26 = vsel %vm1381_vm6, %v1380_v22, %v1024_v32 }
 0x330   : > { %1666 = vrot.lane.b32.xlu1 %v4058_v60, %s2572_s4  ;;  %1570 = vrot.lane.b32.xlu0 %v1477_v5, %s2571_s30  ;;  %v1478_v60 = vsel %vm1447_vm8, %v1445_v16, %v1214_v21  ;;  %v1446_v10 = vsel %vm1414_vm7, %v1413_v26, %v1120_v18 }
 0x332   : > { %v1216_v12 = vpop.permute.xlu1 %1215  ;;  %v1611_v30 = vpop.permute.xlu0 %1610 }
 0x333   : > { %v1706_v29 = vsel %vm1704_vm9, %v1515_v51, %v1611_v30  ;;  %v1479_v25 = vsel %vm1447_vm8, %v1446_v10, %v1216_v12 }
 0x334   : > { %1668 = vrot.lane.b32.xlu1 %v1118_v8, %s2572_s4  ;;  %1572 = vrot.lane.b32.xlu0 %v1478_v60, %s2571_s30 }
 0x335   : > { %2387 = vmatmul.mubr.msk.f32.vlgmr.msra.gmra.mrb[0].mxu1 %vm1739_vm10, %v1706_v29 }
 0x336   : > { %v1613_v31 = vpop.permute.xlu1 %1612  ;;  %v1517_v41 = vpop.permute.xlu0 %1516 }
 0x337   : > { %v1707_v37 = vsel %vm1704_vm9, %v1517_v41, %v1613_v31 }
 0x338   : > { %1670 = vrot.lane.b32.xlu1 %v1216_v12, %s2572_s4  ;;  %1574 = vrot.lane.b32.xlu0 %v1479_v25, %s2571_s30 }
 0x339   : > { %2389 = vmatprep.mubr.msk.f32.mxu1 %vm1739_vm10, %v1707_v37 }
 0x33a   : > { %v1615_v17 = vpop.permute.xlu1 %1614  ;;  %v1519_v48 = vpop.permute.xlu0 %1518 }
 0x33b   : > { %v1708_v49 = vsel %vm1704_vm9, %v1519_v48, %v1615_v17 }
 0x33c   : > { %2390 = vmatmul.mubr.msk.f32.gmra.mrb[2].mxu1 %vm1739_vm10, %v1708_v49 }
 0x33e   : > { %v1617_v20 = vpop.permute.xlu1 %1616  ;;  %v1521_v58 = vpop.permute.xlu0 %1520 }
 0x33f   : > { %v1709_v32 = vsel %vm1704_vm9, %v1521_v58, %v1617_v20 }
 0x340   : > { %2392 = vmatprep.mubr.msk.f32.mxu1 %vm1739_vm10, %v1709_v32 }
 0x342   : > { %v1619_v50 = vpop.permute.xlu1 %1618  ;;  %v1523_v23 = vpop.permute.xlu0 %1522 }
 0x343   : > { %v1710_v7 = vsel %vm1704_vm9, %v1523_v23, %v1619_v50 }
 0x344   : > { %2393 = vmatmul.mubr.msk.f32.gmra.mrb[4].mxu1 %vm1739_vm10, %v1710_v7 }
 0x346   : > { %v1621_v13 = vpop.permute.xlu1 %1620  ;;  %v1525_v53 = vpop.permute.xlu0 %1524 }
 0x347   : > { %v1711_v24 = vsel %vm1704_vm9, %v1525_v53, %v1621_v13 }
 0x348   : > { %2395 = vmatprep.mubr.msk.f32.mxu1 %vm1739_vm10, %v1711_v24 }
 0x34a   : > { %v1623_v52 = vpop.permute.xlu1 %1622  ;;  %v1527_v9 = vpop.permute.xlu0 %1526 }
 0x34b   : > { %v1712_v38 = vsel %vm1704_vm9, %v1527_v9, %v1623_v52 }
 0x34c   : > { %2396 = vmatmul.mubr.msk.f32.gmra.mrb[6].mxu1 %vm1739_vm10, %v1712_v38 }
 0x34e   : > { %v1625_v46 = vpop.permute.xlu1 %1624  ;;  %v1529_v57 = vpop.permute.xlu0 %1528 }
 0x34f   : > { %v1713_v4 = vsel %vm1704_vm9, %v1529_v57, %v1625_v46 }
 0x350   : > { %2398 = vmatprep.mubr.msk.f32.mxu1 %vm1739_vm10, %v1713_v4 }
 0x352   : > { %v1627_v8 = vpop.permute.xlu1 %1626  ;;  %v1531_v43 = vpop.permute.xlu0 %1530 }
 0x353   : > { %v1714_v35 = vsel %vm1704_vm9, %v1531_v43, %v1627_v8 }
 0x354   : > { %2399 = vmatmul.mubr.msk.f32.gmra.mrb[8].mxu1 %vm1739_vm10, %v1714_v35 }
 0x356   : > { %v1629_v19 = vpop.permute.xlu1 %1628  ;;  %v1533_v40 = vpop.permute.xlu0 %1532 }
 0x357   : > { %v1715_v44 = vsel %vm1704_vm9, %v1533_v40, %v1629_v19 }
 0x358   : > { %2401 = vmatprep.mubr.msk.f32.mxu1 %vm1739_vm10, %v1715_v44 }
 0x35a   : > { %v1631_v63 = vpop.permute.xlu1 %1630  ;;  %v1535_v0 = vpop.permute.xlu0 %1534 }
 0x35b   : > { %v1716_v28 = vsel %vm1704_vm9, %v1535_v0, %v1631_v63 }
 0x35c   : > { %2402 = vmatmul.mubr.msk.f32.gmra.mrb[10].mxu1 %vm1739_vm10, %v1716_v28 }
 0x35e   : > { %v1633_v42 = vpop.permute.xlu1 %1632  ;;  %v1537_v34 = vpop.permute.xlu0 %1536 }
 0x35f   : > { %v1717_v18 = vsel %vm1704_vm9, %v1537_v34, %v1633_v42 }
 0x360   : > { %2404 = vmatprep.mubr.msk.f32.mxu1 %vm1739_vm10, %v1717_v18 }
 0x362   : > { %v1635_v2 = vpop.permute.xlu1 %1634  ;;  %v1539_v1 = vpop.permute.xlu0 %1538 }
 0x363   : > { %v1718_v61 = vsel %vm1704_vm9, %v1539_v1, %v1635_v2 }
 0x364   : > { %2405 = vmatmul.mubr.msk.f32.gmra.mrb[12].mxu1 %vm1739_vm10, %v1718_v61 }
 0x366   : > { %v1637_v15 = vpop.permute.xlu1 %1636  ;;  %v1541_v45 = vpop.permute.xlu0 %1540 }
 0x367   : > { %v1719_v11 = vsel %vm1704_vm9, %v1541_v45, %v1637_v15 }
 0x368   : > { %2407 = vmatprep.mubr.msk.f32.mxu1 %vm1739_vm10, %v1719_v11 }
 0x36a   : > { %v1639_v55 = vpop.permute.xlu1 %1638  ;;  %v1543_v36 = vpop.permute.xlu0 %1542 }
 0x36b   : > { %v1720_v62 = vsel %vm1704_vm9, %v1543_v36, %v1639_v55 }
 0x36c   : > { %2408 = vmatmul.mubr.msk.f32.gmra.mrb[14].mxu1 %vm1739_vm10, %v1720_v62 }
 0x36e   : > { %v1641_v56 = vpop.permute.xlu1 %1640  ;;  %v1545_v47 = vpop.permute.xlu0 %1544 }
 0x36f   : > { %v1721_v51 = vsel %vm1704_vm9, %v1545_v47, %v1641_v56 }
 0x370   : > { %2410 = vmatprep.mubr.msk.f32.mxu1 %vm1739_vm10, %v1721_v51 }
 0x372   : > { %v1643_v21 = vpop.permute.xlu1 %1642  ;;  %v1547_v59 = vpop.permute.xlu0 %1546 }
 0x373   : > { %v1722_v5 = vsel %vm1704_vm9, %v1547_v59, %v1643_v21 }
 0x374   : > { %2411 = vmatmul.mubr.msk.f32.gmra.mrb[16].mxu1 %vm1739_vm10, %v1722_v5 }
 0x376   : > { %v1645_v27 = vpop.permute.xlu1 %1644  ;;  %v1549_v39 = vpop.permute.xlu0 %1548 }
 0x377   : > { %v1723_v14 = vsel %vm1704_vm9, %v1549_v39, %v1645_v27 }
 0x378   : > { %2413 = vmatprep.mubr.msk.f32.mxu1 %vm1739_vm10, %v1723_v14 }
 0x37a   : > { %v1647_v33 = vpop.permute.xlu1 %1646  ;;  %v1551_v6 = vpop.permute.xlu0 %1550 }
 0x37b   : > { %v1724_v54 = vsel %vm1704_vm9, %v1551_v6, %v1647_v33 }
 0x37c   : > { %2414 = vmatmul.mubr.msk.f32.gmra.mrb[18].mxu1 %vm1739_vm10, %v1724_v54 }
 0x37e   : > { %v1649_v16 = vpop.permute.xlu1 %1648  ;;  %v1553_v12 = vpop.permute.xlu0 %1552 }
 0x37f   : > { %v1725_v30 = vsel %vm1704_vm9, %v1553_v12, %v1649_v16 }
 0x380   : > { %2416 = vmatprep.mubr.msk.f32.mxu1 %vm1739_vm10, %v1725_v30 }
 0x382   : > { %v1651_v3 = vpop.permute.xlu1 %1650  ;;  %v1555_v60 = vpop.permute.xlu0 %1554 }
 0x383   : > { %v1726_v29 = vsel %vm1704_vm9, %v1555_v60, %v1651_v3 }
 0x384   : > { %2417 = vmatmul.mubr.msk.f32.gmra.mrb[20].mxu1 %vm1739_vm10, %v1726_v29 }
 0x386   : > { %v1653_v22 = vpop.permute.xlu1 %1652  ;;  %v1557_v26 = vpop.permute.xlu0 %1556 }
 0x387   : > { %v1727_v10 = vsel %vm1704_vm9, %v1557_v26, %v1653_v22 }
 0x388   : > { %2419 = vmatprep.mubr.msk.f32.mxu1 %vm1739_vm10, %v1727_v10 }
 0x38a   : > { %v1655_v31 = vpop.permute.xlu1 %1654  ;;  %v1559_v41 = vpop.permute.xlu0 %1558 }
 0x38b   : > { %v1728_v25 = vsel %vm1704_vm9, %v1559_v41, %v1655_v31 }
 0x38c   : > { %2420 = vmatmul.mubr.msk.f32.gmra.mrb[22].mxu1 %vm1739_vm10, %v1728_v25 }
 0x38e   : > { %v1657_v37 = vpop.permute.xlu1 %1656  ;;  %v1561_v17 = vpop.permute.xlu0 %1560 }
 0x38f   : > { %v1729_v48 = vsel %vm1704_vm9, %v1561_v17, %v1657_v37 }
 0x390   : > { %2422 = vmatprep.mubr.msk.f32.mxu1 %vm1739_vm10, %v1729_v48 }
 0x392   : > { %v1659_v49 = vpop.permute.xlu1 %1658  ;;  %v1563_v20 = vpop.permute.xlu0 %1562 }
 0x393   : > { %v1730_v58 = vsel %vm1704_vm9, %v1563_v20, %v1659_v49 }
 0x394   : > { %2423 = vmatmul.mubr.msk.f32.gmra.mrb[24].mxu1 %vm1739_vm10, %v1730_v58 }
 0x396   : > { %v1661_v32 = vpop.permute.xlu1 %1660  ;;  %v1565_v50 = vpop.permute.xlu0 %1564 }
 0x397   : > { %v1731_v23 = vsel %vm1704_vm9, %v1565_v50, %v1661_v32 }
 0x398   : > { %2425 = vmatprep.mubr.msk.f32.mxu1 %vm1739_vm10, %v1731_v23 }
 0x39a   : > { %v1663_v7 = vpop.permute.xlu1 %1662  ;;  %v1567_v13 = vpop.permute.xlu0 %1566 }
 0x39b   : > { %v1732_v53 = vsel %vm1704_vm9, %v1567_v13, %v1663_v7 }
 0x39c   : > { %2426 = vmatmul.mubr.msk.f32.gmra.mrb[26].mxu1 %vm1739_vm10, %v1732_v53 }
 0x39e   : > { %v1665_v24 = vpop.permute.xlu1 %1664  ;;  %v1569_v52 = vpop.permute.xlu0 %1568 }
 0x39f   : > { %v1733_v9 = vsel %vm1704_vm9, %v1569_v52, %v1665_v24 }
 0x3a0   : > { %2428 = vmatprep.mubr.msk.f32.mxu1 %vm1739_vm10, %v1733_v9 }
 0x3a2   : > { %v1667_v38 = vpop.permute.xlu1 %1666  ;;  %v1571_v46 = vpop.permute.xlu0 %1570 }
 0x3a3   : > { %v1734_v57 = vsel %vm1704_vm9, %v1571_v46, %v1667_v38 }
 0x3a4   : > { %2429 = vmatmul.mubr.msk.f32.gmra.mrb[28].mxu1 %vm1739_vm10, %v1734_v57 }
 0x3a6   : > { %v1669_v4 = vpop.permute.xlu1 %1668  ;;  %v1573_v8 = vpop.permute.xlu0 %1572 }
 0x3a7   : > { %v1735_v43 = vsel %vm1704_vm9, %v1573_v8, %v1669_v4 }
 0x3a8   : > { %2431 = vmatprep.mubr.msk.f32.mxu1 %vm1739_vm10, %v1735_v43 }
 0x3aa   : > { %v1671_v35 = vpop.permute.xlu1 %1670  ;;  %v1575_v19 = vpop.permute.xlu0 %1574 }
 0x3ab   : > { %v1736_v40 = vsel %vm1704_vm9, %v1575_v19, %v1671_v35 }
 0x3ac   : > { %2432 = vmatmul.mubr.msk.f32.gmra.mrb[30].mxu1 %vm1739_vm10, %v1736_v40 }
 0x408   : > { %v2388_v44 = vpop.f32.mrb[0].mxu1 }
 0x409   : > { %2063 = vst.msk [vmem:[%s4311_s7 + $0x8] sm:$0xff] %vm2061_vm11, %v2388_v44  ;;  %v1902_v63 = vpop.f32.mrb[1].mxu1 }
 0x40a   : > { %2062 = vst.msk [vmem:[%s4311_s7] sm:$0xff] %vm2061_vm11, %v1902_v63 }
 0x40f   : > { %v2391_v0 = vpop.f32.mrb[2].mxu1 }
 0x410   : > { %2065 = vst.msk [vmem:[%s4311_s7 + $0x18] sm:$0xff] %vm2061_vm11, %v2391_v0  ;;  %v1912_v28 = vpop.f32.mrb[3].mxu1 }
 0x411   : > { %2064 = vst.msk [vmem:[%s4311_s7 + $0x10] sm:$0xff] %vm2061_vm11, %v1912_v28 }
 0x417   : > { %v2394_v42 = vpop.f32.mrb[4].mxu1 }
 0x418   : > { %2067 = vst.msk [vmem:[%s4311_s7 + $0x28] sm:$0xff] %vm2061_vm11, %v2394_v42  ;;  %v1922_v34 = vpop.f32.mrb[5].mxu1 }
 0x419   : > { %2066 = vst.msk [vmem:[%s4311_s7 + $0x20] sm:$0xff] %vm2061_vm11, %v1922_v34 }
 0x41f   : > { %v2397_v18 = vpop.f32.mrb[6].mxu1 }
 0x420   : > { %2069 = vst.msk [vmem:[%s4311_s7 + $0x38] sm:$0xff] %vm2061_vm11, %v2397_v18  ;;  %v1932_v2 = vpop.f32.mrb[7].mxu1 }
 0x421   : > { %2068 = vst.msk [vmem:[%s4311_s7 + $0x30] sm:$0xff] %vm2061_vm11, %v1932_v2 }
 0x427   : > { %v2400_v1 = vpop.f32.mrb[8].mxu1 }
 0x428   : > { %2071 = vst.msk [vmem:[%s4311_s7 + $0x48] sm:$0xff] %vm2061_vm11, %v2400_v1  ;;  %v1942_v61 = vpop.f32.mrb[9].mxu1 }
 0x429   : > { %2070 = vst.msk [vmem:[%s4311_s7 + $0x40] sm:$0xff] %vm2061_vm11, %v1942_v61 }
 0x42f   : > { %v2403_v15 = vpop.f32.mrb[10].mxu1 }
 0x430   : > { %2073 = vst.msk [vmem:[%s4311_s7 + $0x58] sm:$0xff] %vm2061_vm11, %v2403_v15  ;;  %v1952_v45 = vpop.f32.mrb[11].mxu1 }
 0x431   : > { %2072 = vst.msk [vmem:[%s4311_s7 + $0x50] sm:$0xff] %vm2061_vm11, %v1952_v45 }
 0x437   : > { %v2406_v11 = vpop.f32.mrb[12].mxu1 }
 0x438   : > { %2075 = vst.msk [vmem:[%s4311_s7 + $0x68] sm:$0xff] %vm2061_vm11, %v2406_v11  ;;  %v1962_v55 = vpop.f32.mrb[13].mxu1 }
 0x439   : > { %2074 = vst.msk [vmem:[%s4311_s7 + $0x60] sm:$0xff] %vm2061_vm11, %v1962_v55 }
 0x43f   : > { %v2409_v36 = vpop.f32.mrb[14].mxu1 }
 0x440   : > { %2077 = vst.msk [vmem:[%s4311_s7 + $0x78] sm:$0xff] %vm2061_vm11, %v2409_v36  ;;  %v1972_v62 = vpop.f32.mrb[15].mxu1 }
 0x441   : > { %2076 = vst.msk [vmem:[%s4311_s7 + $0x70] sm:$0xff] %vm2061_vm11, %v1972_v62 }
 0x447   : > { %v2412_v56 = vpop.f32.mrb[16].mxu1 }
 0x448   : > { %2079 = vst.msk [vmem:[%s4311_s7 + $0x88] sm:$0xff] %vm2061_vm11, %v2412_v56  ;;  %v1982_v47 = vpop.f32.mrb[17].mxu1 }
 0x449   : > { %2078 = vst.msk [vmem:[%s4311_s7 + $0x80] sm:$0xff] %vm2061_vm11, %v1982_v47 }
 0x44f   : > { %v2415_v51 = vpop.f32.mrb[18].mxu1 }
 0x450   : > { %2081 = vst.msk [vmem:[%s4311_s7 + $0x98] sm:$0xff] %vm2061_vm11, %v2415_v51  ;;  %v1992_v21 = vpop.f32.mrb[19].mxu1 }
 0x451   : > { %2080 = vst.msk [vmem:[%s4311_s7 + $0x90] sm:$0xff] %vm2061_vm11, %v1992_v21 }
 0x457   : > { %v2418_v59 = vpop.f32.mrb[20].mxu1 }
 0x458   : > { %2083 = vst.msk [vmem:[%s4311_s7 + $0xa8] sm:$0xff] %vm2061_vm11, %v2418_v59  ;;  %v2002_v5 = vpop.f32.mrb[21].mxu1 }
 0x459   : > { %2082 = vst.msk [vmem:[%s4311_s7 + $0xa0] sm:$0xff] %vm2061_vm11, %v2002_v5 }
 0x45f   : > { %v2421_v27 = vpop.f32.mrb[22].mxu1 }
 0x460   : > { %2085 = vst.msk [vmem:[%s4311_s7 + $0xb8] sm:$0xff] %vm2061_vm11, %v2421_v27  ;;  %v2012_v39 = vpop.f32.mrb[23].mxu1 }
 0x461   : > { %2084 = vst.msk [vmem:[%s4311_s7 + $0xb0] sm:$0xff] %vm2061_vm11, %v2012_v39 }
 0x467   : > { %v2424_v14 = vpop.f32.mrb[24].mxu1 }
 0x468   : > { %2087 = vst.msk [vmem:[%s4311_s7 + $0xc8] sm:$0xff] %vm2061_vm11, %v2424_v14  ;;  %v2022_v33 = vpop.f32.mrb[25].mxu1 }
 0x469   : > { %2086 = vst.msk [vmem:[%s4311_s7 + $0xc0] sm:$0xff] %vm2061_vm11, %v2022_v33 }
 0x46f   : > { %v2427_v6 = vpop.f32.mrb[26].mxu1 }
 0x470   : > { %2089 = vst.msk [vmem:[%s4311_s7 + $0xd8] sm:$0xff] %vm2061_vm11, %v2427_v6  ;;  %v2032_v54 = vpop.f32.mrb[27].mxu1 }
 0x471   : > { %2088 = vst.msk [vmem:[%s4311_s7 + $0xd0] sm:$0xff] %vm2061_vm11, %v2032_v54 }
 0x477   : > { %v2430_v16 = vpop.f32.mrb[28].mxu1 }
 0x478   : > { %2091 = vst.msk [vmem:[%s4311_s7 + $0xe8] sm:$0xff] %vm2061_vm11, %v2430_v16  ;;  %v2042_v12 = vpop.f32.mrb[29].mxu1 }
 0x479   : > { %2090 = vst.msk [vmem:[%s4311_s7 + $0xe0] sm:$0xff] %vm2061_vm11, %v2042_v12 }
 0x47f   : > { %v2433_v30 = vpop.f32.mrb[30].mxu1 }
 0x480   : > { %2093 = vst.msk [vmem:[%s4311_s7 + $0xf8] sm:$0xff] %vm2061_vm11, %v2433_v30  ;;  %v2052_v3 = vpop.f32.mrb[31].mxu1 }
 0x481   : > { %2092 = vst.msk [vmem:[%s4311_s7 + $0xf0] sm:$0xff] %vm2061_vm11, %v2052_v3 }
 0x482   : > { %2513 = shalt.err (!%p2510_p3)
}
 0x483   : > { %s2514_s26 = scalar_lea.hbm %s4378_s17, 4096  ;;  %s2518_s29 = scalar_lea.hbm %s4432_s3, 8192 }
 0x484   : > { %p2515_p4 = scmp.ne.s32.totalorder %s4378_s17, %s2514_s26  ;;  %p2519_p9 = scmp.lt.u32.totalorder %s4378_s17, %s4432_s3 }
 0x485   : > { %p2520_p10 = scmp.lt.u32.totalorder %s2518_s29, %s2514_s26  ;;  %p2522_p12 = scmp.lt.u32.totalorder %s2514_s26, %s4378_s17 }
 0x486   : > { %p2516_p7 = pnand %p2515_p4, %p2634_p5 }
 0x487   : > { %p2521_p11 = por %p2520_p10, %p2519_p9 }
 0x488   : > { %p2517_p8 = pneg %p2516_p7 }
 0x489   : > { %p2523_p13 = por %p2522_p12, %p2521_p11 }
 0x48b   : > { %p2524_p0 = pnand %p2523_p13, %p2517_p8 }
 0x48d   : > { %2527 = shalt.err (!%p2524_p0)
}
 0x48e   : > { %s2574_s5 = smov 128   ;;  %s2575_s6 = smov 8  }
 0x48f   : > { %2450 = dma.vmem_to_hbm [thread:$0]  (%p2634_p5), %s4380_s9, 4096, %s4378_s17, %s4388_s19, %s2574_s5, %s2574_s5, %s2575_s6  }
 0x490 PF: > { %p2456_p1 = scmp.ge.s32.totalorder %s2562_s15, 2  ;;  %s2124_s7 = sand.u32 1, %s2550_s12  }
 0x491   : > { %s2125_s8 = scalar_lea.sflag [#allocation3], %s2124_s7 }
 0x492   : > { %p2453_p2 = pnand %p2456_p1, %p2638_p6 }
 0x494   : > { %2545 = dma.done.wait (!%p2453_p2), %s2125_s8, 4096  }
 0x495   : > { %2547 = vsyncadd (!%p2453_p2), %s2125_s8, 4294963200  ;;  %p13_p3 = scmp.ge.s32.totalorder %s2621_s18, 4   ;;  %s4747_s12 = smov %s2554_s13 }
 0x496   : > { %s4748_s13 = smov %s2558_s14  ;;  %s4749_s14 = smov %s2632_s21 }
 0x497   : > { %s4750_s15 = smov %s2621_s18  ;;  %15 = sbr.rel (!%p13_p3) target bundleno = 3 (0x3), region = 67 }
 0x49e   :  { %2130 = vsyncpa [#allocation3], 1 }
 0x49f   :  { %2132 = vsyncpa [#allocation3 + $0x1], 1 }

</bundles_post_ra>
